<compile_context>
chip_gen: v7x
topology: tpu7x:2x2x1
jax: 0.10.0
libtpu: 0.0.40
codegen_flags: <defaults>
</compile_context>

<pallas_src>
import functools

import jax
import jax.numpy as jnp
import numpy as np
from jax import lax
from jax.experimental import pallas as pl
from jax.experimental.pallas import tpu as pltpu

_LANE = 128
_SUB_ROWS = 8                   # (8,128) sub-tile = 1 f32 vreg per state array
_MAX_BLOCK_ROWS = 512           # up to 512*128 = 64K locations per grid step
_BIG = 99999999.0               # same "masked area" sentinel as torch reference


# ----------------------------- Pallas kernel ------------------------------- #
def _gen_targets_kernel(gt_ref, cls_ref,                        # SMEM (prefetch)
                        x_ref, y_ref, lo_ref, hi_ref, rad_ref,  # VMEM (R,128)
                        cls_out_ref, cnt_out_ref, reg_out_ref,  # VMEM outputs
                        *, m, n_sub, box_unroll, sub_unroll):
    bi = pl.program_id(1)
    big = jnp.float32(_BIG)

    def sub_body(r, carry):
        row = pl.multiple_of(r * _SUB_ROWS, _SUB_ROWS)
        rows = pl.ds(row, _SUB_ROWS)
        x = x_ref[rows, :]              # (8,128) location centers (lane-dense)
        y = y_ref[rows, :]
        lo = lo_ref[rows, :]            # per-location level limits / radius
        hi = hi_ref[rows, :]
        rad = rad_ref[rows, :]

        init = (jnp.full(x.shape, big, jnp.float32),   # best_area
                jnp.zeros(x.shape, jnp.float32),       # best_l
                jnp.zeros(x.shape, jnp.float32),       # best_t
                jnp.zeros(x.shape, jnp.float32),       # best_r
                jnp.zeros(x.shape, jnp.float32),       # best_b
                jnp.zeros(x.shape, jnp.int32))         # best_cls

        def box_body(j, st):
            b_area, b_l, b_t, b_r, b_b, b_c = st
            gx0 = gt_ref[bi * 4 + 0, j]
            gy0 = gt_ref[bi * 4 + 1, j]
            gx1 = gt_ref[bi * 4 + 2, j]
            gy1 = gt_ref[bi * 4 + 3, j]
            cj = cls_ref[bi, j]

            # Per-box constants -> scalar unit (no per-location area tensor).
            area = (gx1 - gx0) * (gy1 - gy0)
            cx = (gx0 + gx1) * 0.5
            cy = (gy0 + gy1) * 0.5

            l_off = x - gx0
            t_off = y - gy0
            r_off = gx1 - x
            b_off = gy1 - y
            off_min = jnp.minimum(jnp.minimum(l_off, t_off),
                                  jnp.minimum(r_off, b_off))
            off_max = jnp.maximum(jnp.maximum(l_off, t_off),
                                  jnp.maximum(r_off, b_off))
            # max(x-cx, cx-x, y-cy, cy-y) == max(|x-cx|, |y-cy|)
            c_max = jnp.maximum(jnp.abs(x - cx), jnp.abs(y - cy))

            pos = ((off_min > 0) & (off_max > lo) & (off_max <= hi)
                   & (c_max < rad))
            # Strict '<' keeps the first box on area ties (matches torch.min /
            # jnp.argmin tie-breaking).
            take = pos & (area < b_area)
            b_area = jnp.where(take, area, b_area)
            b_l = jnp.where(take, l_off, b_l)
            b_t = jnp.where(take, t_off, b_t)
            b_r = jnp.where(take, r_off, b_r)
            b_b = jnp.where(take, b_off, b_b)
            b_c = jnp.where(take, cj, b_c)
            return (b_area, b_l, b_t, b_r, b_b, b_c)

        best_area, best_l, best_t, best_r, best_b, best_c = lax.fori_loop(
            0, m, box_body, init, unroll=box_unroll)

        # Real box areas << _BIG (same assumption the torch sentinel makes),
        # so "at least one positive box" == "best_area got updated".
        any_pos = best_area < big

        lr_min = jnp.minimum(best_l, best_r)
        lr_max = jnp.maximum(best_l, best_r)
        tb_min = jnp.minimum(best_t, best_b)
        tb_max = jnp.maximum(best_t, best_b)
        cnt = jnp.sqrt(lr_min * tb_min / (lr_max * tb_max + 1e-10))

        # Six full-width (8,128) lane-dense stores; no masked narrow stores.
        cls_out_ref[rows, :] = jnp.where(any_pos, best_c, 0)
        cnt_out_ref[rows, :] = jnp.where(any_pos, cnt, -1.0)
        reg_out_ref[0, rows, :] = jnp.where(any_pos, best_l, -1.0)
        reg_out_ref[1, rows, :] = jnp.where(any_pos, best_t, -1.0)
        reg_out_ref[2, rows, :] = jnp.where(any_pos, best_r, -1.0)
        reg_out_ref[3, rows, :] = jnp.where(any_pos, best_b, -1.0)
        return carry

    lax.fori_loop(0, n_sub, sub_body, 0, unroll=sub_unroll)


# ------------------------- host-side static plan --------------------------- #
def _build_plan(shapes_hw, strides, limit_range, ratio, batch):
    """Lane-dense per-location planes (x, y, lmin, lmax, radius), numpy/static."""
    xs, ys, lo, hi, rad = [], [], [], [], []
    for (h, w), s, (lmin, lmax) in zip(shapes_hw, strides, limit_range):
        n = h * w
        # coords_fmap2orig, row-major flatten: x varies fastest.
        xs.append(np.tile(np.arange(w, dtype=np.float32) * s + s // 2, h))
        ys.append(np.repeat(np.arange(h, dtype=np.float32) * s + s // 2, w))
        lo.append(np.full(n, float(lmin), np.float32))
        hi.append(np.full(n, float(lmax), np.float32))
        rad.append(np.full(n, float(s) * ratio, np.float32))
    x = np.concatenate(xs)
    y = np.concatenate(ys)
    lo = np.concatenate(lo)
    hi = np.concatenate(hi)
    rad = np.concatenate(rad)
    n_total = int(x.size)

    rows = -(-n_total // _LANE)
    rows = -(-rows // _SUB_ROWS) * _SUB_ROWS
    block_rows = min(_MAX_BLOCK_ROWS, rows)
    if batch == 1 and rows >= 2 * _SUB_ROWS:
        # v7x has 2 TensorCores: keep at least 2 parallel grid steps.
        block_rows = min(block_rows,
                         max(_SUB_ROWS, (rows // 2) // _SUB_ROWS * _SUB_ROWS))
    rows_pad = -(-rows // block_rows) * block_rows
    n_pad = rows_pad * _LANE

    def plane(a):
        return np.pad(a, (0, n_pad - n_total)).reshape(rows_pad, _LANE)

    return (plane(x), plane(y), plane(lo), plane(hi), plane(rad),
            n_total, block_rows, rows_pad)


# -------------------------------- wrapper ----------------------------------- #
def gen_targets(inputs, strides, limit_range, sample_radiu_ratio=1.5):
    """JAX/Pallas equivalent of GenTargets.forward (all FPN levels, one call)."""
    cls_logits, _cnt_logits, _reg_preds = inputs[0]
    gt_boxes = inputs[1]
    classes = inputs[2]
    assert len(strides) == len(cls_logits) == len(limit_range)

    shapes_hw = [tuple(l.shape[2:4]) for l in cls_logits]          # NCHW
    b, m, _ = gt_boxes.shape
    (x2d, y2d, lo2d, hi2d, rad2d,
     n_total, block_rows, rows_pad) = _build_plan(
         shapes_hw, strides, limit_range, sample_radiu_ratio, int(b))

    num_blocks = rows_pad // block_rows
    n_sub = block_rows // _SUB_ROWS

    # SMEM gt table: row (b*4 + k) holds coordinate k of every box in batch b.
    gt_s = jnp.transpose(gt_boxes.astype(jnp.float32), (0, 2, 1)).reshape(b * 4, m)
    cls_s = classes.astype(jnp.int32)

    kern = functools.partial(
        _gen_targets_kernel, m=int(m), n_sub=int(n_sub),
        box_unroll=int(max(1, min(8, int(m)))),
        sub_unroll=2 if n_sub >= 2 else 1)

    cost = pl.CostEstimate(
        flops=int(35 * m * b * rows_pad * _LANE),
        transcendentals=int(b * rows_pad * _LANE),
        bytes_accessed=int(rows_pad * _LANE * (5 * 4 + 24 * b) + 20 * b * m))

    cls_pad, cnt_pad, reg_pad = pl.pallas_call(
        kern,
        out_shape=(
            jax.ShapeDtypeStruct((b, rows_pad, _LANE), jnp.int32),
            jax.ShapeDtypeStruct((b, rows_pad, _LANE), jnp.float32),
            jax.ShapeDtypeStruct((b, 4, rows_pad, _LANE), jnp.float32),
        ),
        grid_spec=pltpu.PrefetchScalarGridSpec(
            num_scalar_prefetch=2,
            grid=(num_blocks, b),          # batch innermost: coord blocks reused
            in_specs=[
                pl.BlockSpec((block_rows, _LANE), lambda t, bi, *_: (t, 0)),  # x
                pl.BlockSpec((block_rows, _LANE), lambda t, bi, *_: (t, 0)),  # y
                pl.BlockSpec((block_rows, _LANE), lambda t, bi, *_: (t, 0)),  # lmin
                pl.BlockSpec((block_rows, _LANE), lambda t, bi, *_: (t, 0)),  # lmax
                pl.BlockSpec((block_rows, _LANE), lambda t, bi, *_: (t, 0)),  # radius
            ],
            out_specs=[
                pl.BlockSpec((None, block_rows, _LANE),
                             lambda t, bi, *_: (bi, t, 0)),
                pl.BlockSpec((None, block_rows, _LANE),
                             lambda t, bi, *_: (bi, t, 0)),
                pl.BlockSpec((None, 4, block_rows, _LANE),
                             lambda t, bi, *_: (bi, 0, t, 0)),
            ]),
        compiler_params=pltpu.CompilerParams(
            dimension_semantics=("parallel", "parallel"),
            vmem_limit_bytes=32 * 1024 * 1024),
        cost_estimate=cost,
    )(gt_s, cls_s, jnp.asarray(x2d), jnp.asarray(y2d),
      jnp.asarray(lo2d), jnp.asarray(hi2d), jnp.asarray(rad2d))

    # Slim epilogue: one trailing slice per output (+ transpose for (B,N,4)).
    cls_t = cls_pad.reshape(b, -1)[:, :n_total][..., None]
    cnt_t = cnt_pad.reshape(b, -1)[:, :n_total][..., None]
    reg_t = jnp.transpose(reg_pad.reshape(b, 4, -1)[:, :, :n_total], (0, 2, 1))
    return cls_t, cnt_t, reg_t


# -------------------------- pure-JAX reference ------------------------------ #
def _ref_level(h, w, gt_boxes, classes, stride, limit_range, ratio=1.5):
    sx = jnp.arange(0, w * stride, stride, dtype=jnp.float32)
    sy = jnp.arange(0, h * stride, stride, dtype=jnp.float32)
    yy, xx = jnp.meshgrid(sy, sx, indexing="ij")
    x = xx.reshape(-1) + stride // 2
    y = yy.reshape(-1) + stride // 2
    l_off = x[None, :, None] - gt_boxes[..., 0][:, None, :]
    t_off = y[None, :, None] - gt_boxes[..., 1][:, None, :]
    r_off = gt_boxes[..., 2][:, None, :] - x[None, :, None]
    b_off = gt_boxes[..., 3][:, None, :] - y[None, :, None]
    ltrb = jnp.stack([l_off, t_off, r_off, b_off], axis=-1)
    areas = (ltrb[..., 0] + ltrb[..., 2]) * (ltrb[..., 1] + ltrb[..., 3])
    off_min = ltrb.min(-1)
    off_max = ltrb.max(-1)
    mask_in_gt = off_min > 0
    mask_in_level = (off_max > limit_range[0]) & (off_max <= limit_range[1])
    radius = stride * ratio
    cx = (gt_boxes[..., 0] + gt_boxes[..., 2]) / 2
    cy = (gt_boxes[..., 1] + gt_boxes[..., 3]) / 2
    c_ltrb = jnp.stack([x[None, :, None] - cx[:, None, :],
                        y[None, :, None] - cy[:, None, :],
                        cx[:, None, :] - x[None, :, None],
                        cy[:, None, :] - y[None, :, None]], axis=-1)
    mask_center = c_ltrb.max(-1) < radius
    mask_pos = mask_in_gt & mask_in_level & mask_center
    areas = jnp.where(mask_pos, areas, 99999999.0)
    amin_ind = jnp.argmin(areas, axis=-1)
    reg_targets = jnp.take_along_axis(
        ltrb, amin_ind[..., None, None], axis=2)[:, :, 0, :]
    cls_b = jnp.broadcast_to(classes[:, None, :].astype(jnp.int32), areas.shape)
    cls_targets = jnp.take_along_axis(cls_b, amin_ind[..., None], axis=-1)
    lr_min = jnp.minimum(reg_targets[..., 0], reg_targets[..., 2])
    lr_max = jnp.maximum(reg_targets[..., 0], reg_targets[..., 2])
    tb_min = jnp.minimum(reg_targets[..., 1], reg_targets[..., 3])
    tb_max = jnp.maximum(reg_targets[..., 1], reg_targets[..., 3])
    cnt_targets = jnp.sqrt(lr_min * tb_min / (lr_max * tb_max + 1e-10))[..., None]
    pos2 = mask_pos.sum(-1) >= 1
    cls_targets = jnp.where(pos2[..., None], cls_targets, 0)
    cnt_targets = jnp.where(pos2[..., None], cnt_targets, -1.0)
    reg_targets = jnp.where(pos2[..., None], reg_targets, -1.0)
    return cls_targets, cnt_targets, reg_targets


def gen_targets_ref(inputs, strides, limit_range):
    cls_logits, _, _ = inputs[0]
    gt_boxes, classes = inputs[1], inputs[2]
    outs = [[], [], []]
    for lvl in range(len(strides)):
        _, _, h, w = cls_logits[lvl].shape
        res = _ref_level(h, w, gt_boxes, classes, strides[lvl], limit_range[lvl])
        for i in range(3):
            outs[i].append(res[i])
    return tuple(jnp.concatenate(o, axis=1) for o in outs)


# ---------------------------------- main ------------------------------------ #
if __name__ == "__main__":
    key = jax.random.PRNGKey(0)
    batch, class_num, m = 2, 4, 8
    strides = [8, 16, 32]
    limit_range = [[-1, 64], [64, 128], [128, 999999]]
    img = 64  # image size -> feature maps 8x8, 4x4, 2x2

    # Logits only contribute shapes (module never reads their values).
    cls_logits = [jnp.zeros((batch, class_num, img // s, img // s),
                            jnp.float32) for s in strides]
    cnt_logits = [jnp.zeros((batch, 1, img // s, img // s), jnp.float32)
                  for s in strides]
    reg_preds = [jnp.zeros((batch, 4, img // s, img // s), jnp.float32)
                 for s in strides]

    k1, k2, k3, k4, k5 = jax.random.split(key, 5)
    x0 = jax.random.uniform(k1, (batch, m), minval=0.0, maxval=40.0)
    y0 = jax.random.uniform(k2, (batch, m), minval=0.0, maxval=40.0)
    bw = jax.random.uniform(k3, (batch, m), minval=8.0, maxval=24.0)
    bh = jax.random.uniform(k4, (batch, m), minval=8.0, maxval=24.0)
    gt_boxes = jnp.stack([x0, y0, x0 + bw, y0 + bh], axis=-1)       # [B, m, 4]
    classes = jax.random.randint(k5, (batch, m), 1, class_num + 1)  # [B, m]

    inputs = [(cls_logits, cnt_logits, reg_preds), gt_boxes, classes]

    cls_t, cnt_t, reg_t = gen_targets(inputs, strides, limit_range)
    jax.block_until_ready((cls_t, cnt_t, reg_t))

    cls_r, cnt_r, reg_r = gen_targets_ref(inputs, strides, limit_range)
    np.testing.assert_array_equal(np.asarray(cls_t), np.asarray(cls_r))
    np.testing.assert_allclose(np.asarray(cnt_t), np.asarray(cnt_r),
                               rtol=1e-5, atol=1e-5)
    np.testing.assert_allclose(np.asarray(reg_t), np.asarray(reg_r),
                               rtol=1e-5, atol=1e-5)

    print("KERNEL_OK")
</pallas_src>

<mosaic_0001>
module attributes {stable_mosaic.version = 11 : i64} {
  func.func @_gen_targets_kernel(%arg0: i32, %arg1: i32, %arg2: memref<8x8xf32, #tpu.memory_space<smem>>, %arg3: memref<2x8xi32, #tpu.memory_space<smem>>, %arg4: memref<8x128xf32, #tpu.memory_space<vmem>>, %arg5: memref<8x128xf32, #tpu.memory_space<vmem>>, %arg6: memref<8x128xf32, #tpu.memory_space<vmem>>, %arg7: memref<8x128xf32, #tpu.memory_space<vmem>>, %arg8: memref<8x128xf32, #tpu.memory_space<vmem>>, %arg9: memref<1x8x128xi32, #tpu.memory_space<vmem>>, %arg10: memref<1x8x128xf32, #tpu.memory_space<vmem>>, %arg11: memref<1x4x8x128xf32, #tpu.memory_space<vmem>>) attributes {dimension_semantics = [#tpu.dimension_semantics<parallel>, #tpu.dimension_semantics<parallel>], iteration_bounds = array<i64: 1, 2>, scalar_prefetch = 2 : i64, scratch_operands = 0 : i64, tpu.core_type = #tpu.core_type<tc>, window_params = [{transform_indices = @transform_0, window_bounds = array<i64: 8, 128>}, {transform_indices = @transform_1, window_bounds = array<i64: 8, 128>}, {transform_indices = @transform_2, window_bounds = array<i64: 8, 128>}, {transform_indices = @transform_3, window_bounds = array<i64: 8, 128>}, {transform_indices = @transform_4, window_bounds = array<i64: 8, 128>}, {transform_indices = @transform_5, window_bounds = array<i64: 1, 8, 128>}, {transform_indices = @transform_6, window_bounds = array<i64: 1, 8, 128>}, {transform_indices = @transform_7, window_bounds = array<i64: 1, 4, 8, 128>}]} {
    %cst = arith.constant 1.000000e+08 : f32
    %c0_i32 = arith.constant 0 : i32
    %c8_i32 = arith.constant 8 : i32
    %0 = arith.muli %c0_i32, %c8_i32 : i32
    %1 = tpu.assume_multiple %0, 8 : i32
    %2 = arith.index_cast %1 : i32 to index
    %c0 = arith.constant 0 : index
    %3 = vector.load %arg4[%2, %c0] : memref<8x128xf32, #tpu.memory_space<vmem>>, vector<8x128xf32>
    %4 = arith.index_cast %1 : i32 to index
    %c0_0 = arith.constant 0 : index
    %5 = vector.load %arg5[%4, %c0_0] : memref<8x128xf32, #tpu.memory_space<vmem>>, vector<8x128xf32>
    %6 = arith.index_cast %1 : i32 to index
    %c0_1 = arith.constant 0 : index
    %7 = vector.load %arg6[%6, %c0_1] : memref<8x128xf32, #tpu.memory_space<vmem>>, vector<8x128xf32>
    %8 = arith.index_cast %1 : i32 to index
    %c0_2 = arith.constant 0 : index
    %9 = vector.load %arg7[%8, %c0_2] : memref<8x128xf32, #tpu.memory_space<vmem>>, vector<8x128xf32>
    %10 = arith.index_cast %1 : i32 to index
    %c0_3 = arith.constant 0 : index
    %11 = vector.load %arg8[%10, %c0_3] : memref<8x128xf32, #tpu.memory_space<vmem>>, vector<8x128xf32>
    %12 = vector.broadcast %cst : f32 to vector<8x128xf32>
    %cst_4 = arith.constant 0.000000e+00 : f32
    %13 = vector.broadcast %cst_4 : f32 to vector<8x128xf32>
    %cst_5 = arith.constant 0.000000e+00 : f32
    %14 = vector.broadcast %cst_5 : f32 to vector<8x128xf32>
    %cst_6 = arith.constant 0.000000e+00 : f32
    %15 = vector.broadcast %cst_6 : f32 to vector<8x128xf32>
    %cst_7 = arith.constant 0.000000e+00 : f32
    %16 = vector.broadcast %cst_7 : f32 to vector<8x128xf32>
    %c0_i32_8 = arith.constant 0 : i32
    %17 = vector.broadcast %c0_i32_8 : i32 to vector<8x128xi32>
    %c0_i32_9 = arith.constant 0 : i32
    %c4_i32 = arith.constant 4 : i32
    %18 = arith.muli %arg1, %c4_i32 : i32
    %c0_i32_10 = arith.constant 0 : i32
    %19 = arith.addi %18, %c0_i32_10 : i32
    %20 = arith.index_cast %19 : i32 to index
    %21 = arith.index_cast %c0_i32_9 : i32 to index
    %22 = memref.load %arg2[%20, %21] : memref<8x8xf32, #tpu.memory_space<smem>>
    %c4_i32_11 = arith.constant 4 : i32
    %23 = arith.muli %arg1, %c4_i32_11 : i32
    %c1_i32 = arith.constant 1 : i32
    %24 = arith.addi %23, %c1_i32 : i32
    %25 = arith.index_cast %24 : i32 to index
    %26 = arith.index_cast %c0_i32_9 : i32 to index
    %27 = memref.load %arg2[%25, %26] : memref<8x8xf32, #tpu.memory_space<smem>>
    %c4_i32_12 = arith.constant 4 : i32
    %28 = arith.muli %arg1, %c4_i32_12 : i32
    %c2_i32 = arith.constant 2 : i32
    %29 = arith.addi %28, %c2_i32 : i32
    %30 = arith.index_cast %29 : i32 to index
    %31 = arith.index_cast %c0_i32_9 : i32 to index
    %32 = memref.load %arg2[%30, %31] : memref<8x8xf32, #tpu.memory_space<smem>>
    %c4_i32_13 = arith.constant 4 : i32
    %33 = arith.muli %arg1, %c4_i32_13 : i32
    %c3_i32 = arith.constant 3 : i32
    %34 = arith.addi %33, %c3_i32 : i32
    %35 = arith.index_cast %34 : i32 to index
    %36 = arith.index_cast %c0_i32_9 : i32 to index
    %37 = memref.load %arg2[%35, %36] : memref<8x8xf32, #tpu.memory_space<smem>>
    %38 = arith.index_cast %arg1 : i32 to index
    %39 = arith.index_cast %c0_i32_9 : i32 to index
    %40 = memref.load %arg3[%38, %39] : memref<2x8xi32, #tpu.memory_space<smem>>
    %41 = arith.subf %32, %22 : f32
    %42 = arith.subf %37, %27 : f32
    %43 = arith.mulf %41, %42 : f32
    %44 = arith.addf %22, %32 : f32
    %cst_14 = arith.constant 5.000000e-01 : f32
    %45 = arith.mulf %44, %cst_14 : f32
    %46 = arith.addf %27, %37 : f32
    %cst_15 = arith.constant 5.000000e-01 : f32
    %47 = arith.mulf %46, %cst_15 : f32
    %48 = vector.broadcast %22 : f32 to vector<8x128xf32>
    %49 = arith.subf %3, %48 : vector<8x128xf32>
    %50 = vector.broadcast %27 : f32 to vector<8x128xf32>
    %51 = arith.subf %5, %50 : vector<8x128xf32>
    %52 = vector.broadcast %32 : f32 to vector<8x128xf32>
    %53 = arith.subf %52, %3 : vector<8x128xf32>
    %54 = vector.broadcast %37 : f32 to vector<8x128xf32>
    %55 = arith.subf %54, %5 : vector<8x128xf32>
    %56 = arith.minimumf %49, %51 : vector<8x128xf32>
    %57 = arith.minimumf %53, %55 : vector<8x128xf32>
    %58 = arith.minimumf %56, %57 : vector<8x128xf32>
    %59 = arith.maximumf %49, %51 : vector<8x128xf32>
    %60 = arith.maximumf %53, %55 : vector<8x128xf32>
    %61 = arith.maximumf %59, %60 : vector<8x128xf32>
    %62 = vector.broadcast %45 : f32 to vector<8x128xf32>
    %63 = arith.subf %3, %62 : vector<8x128xf32>
    %64 = math.absf %63 : vector<8x128xf32>
    %65 = vector.broadcast %47 : f32 to vector<8x128xf32>
    %66 = arith.subf %5, %65 : vector<8x128xf32>
    %67 = math.absf %66 : vector<8x128xf32>
    %68 = arith.maximumf %64, %67 : vector<8x128xf32>
    %cst_16 = arith.constant 0.000000e+00 : f32
    %69 = vector.broadcast %cst_16 : f32 to vector<8x128xf32>
    %70 = arith.cmpf ogt, %58, %69 : vector<8x128xf32>
    %71 = arith.cmpf ogt, %61, %7 : vector<8x128xf32>
    %72 = arith.andi %70, %71 : vector<8x128xi1>
    %73 = arith.cmpf ole, %61, %9 : vector<8x128xf32>
    %74 = arith.andi %72, %73 : vector<8x128xi1>
    %75 = arith.cmpf olt, %68, %11 : vector<8x128xf32>
    %76 = arith.andi %74, %75 : vector<8x128xi1>
    %77 = vector.broadcast %43 : f32 to vector<8x128xf32>
    %78 = arith.cmpf olt, %77, %12 : vector<8x128xf32>
    %79 = arith.andi %76, %78 : vector<8x128xi1>
    %80 = vector.broadcast %43 : f32 to vector<8x128xf32>
    %81 = arith.select %79, %80, %12 : vector<8x128xi1>, vector<8x128xf32>
    %82 = arith.select %79, %49, %13 : vector<8x128xi1>, vector<8x128xf32>
    %83 = arith.select %79, %51, %14 : vector<8x128xi1>, vector<8x128xf32>
    %84 = arith.select %79, %53, %15 : vector<8x128xi1>, vector<8x128xf32>
    %85 = arith.select %79, %55, %16 : vector<8x128xi1>, vector<8x128xf32>
    %86 = vector.broadcast %40 : i32 to vector<8x128xi32>
    %87 = arith.select %79, %86, %17 : vector<8x128xi1>, vector<8x128xi32>
    %c1_i32_17 = arith.constant 1 : i32
    %c4_i32_18 = arith.constant 4 : i32
    %88 = arith.muli %arg1, %c4_i32_18 : i32
    %c0_i32_19 = arith.constant 0 : i32
    %89 = arith.addi %88, %c0_i32_19 : i32
    %90 = arith.index_cast %89 : i32 to index
    %91 = arith.index_cast %c1_i32_17 : i32 to index
    %92 = memref.load %arg2[%90, %91] : memref<8x8xf32, #tpu.memory_space<smem>>
    %c4_i32_20 = arith.constant 4 : i32
    %93 = arith.muli %arg1, %c4_i32_20 : i32
    %c1_i32_21 = arith.constant 1 : i32
    %94 = arith.addi %93, %c1_i32_21 : i32
    %95 = arith.index_cast %94 : i32 to index
    %96 = arith.index_cast %c1_i32_17 : i32 to index
    %97 = memref.load %arg2[%95, %96] : memref<8x8xf32, #tpu.memory_space<smem>>
    %c4_i32_22 = arith.constant 4 : i32
    %98 = arith.muli %arg1, %c4_i32_22 : i32
    %c2_i32_23 = arith.constant 2 : i32
    %99 = arith.addi %98, %c2_i32_23 : i32
    %100 = arith.index_cast %99 : i32 to index
    %101 = arith.index_cast %c1_i32_17 : i32 to index
    %102 = memref.load %arg2[%100, %101] : memref<8x8xf32, #tpu.memory_space<smem>>
    %c4_i32_24 = arith.constant 4 : i32
    %103 = arith.muli %arg1, %c4_i32_24 : i32
    %c3_i32_25 = arith.constant 3 : i32
    %104 = arith.addi %103, %c3_i32_25 : i32
    %105 = arith.index_cast %104 : i32 to index
    %106 = arith.index_cast %c1_i32_17 : i32 to index
    %107 = memref.load %arg2[%105, %106] : memref<8x8xf32, #tpu.memory_space<smem>>
    %108 = arith.index_cast %arg1 : i32 to index
    %109 = arith.index_cast %c1_i32_17 : i32 to index
    %110 = memref.load %arg3[%108, %109] : memref<2x8xi32, #tpu.memory_space<smem>>
    %111 = arith.subf %102, %92 : f32
    %112 = arith.subf %107, %97 : f32
    %113 = arith.mulf %111, %112 : f32
    %114 = arith.addf %92, %102 : f32
    %cst_26 = arith.constant 5.000000e-01 : f32
    %115 = arith.mulf %114, %cst_26 : f32
    %116 = arith.addf %97, %107 : f32
    %cst_27 = arith.constant 5.000000e-01 : f32
    %117 = arith.mulf %116, %cst_27 : f32
    %118 = vector.broadcast %92 : f32 to vector<8x128xf32>
    %119 = arith.subf %3, %118 : vector<8x128xf32>
    %120 = vector.broadcast %97 : f32 to vector<8x128xf32>
    %121 = arith.subf %5, %120 : vector<8x128xf32>
    %122 = vector.broadcast %102 : f32 to vector<8x128xf32>
    %123 = arith.subf %122, %3 : vector<8x128xf32>
    %124 = vector.broadcast %107 : f32 to vector<8x128xf32>
    %125 = arith.subf %124, %5 : vector<8x128xf32>
    %126 = arith.minimumf %119, %121 : vector<8x128xf32>
    %127 = arith.minimumf %123, %125 : vector<8x128xf32>
    %128 = arith.minimumf %126, %127 : vector<8x128xf32>
    %129 = arith.maximumf %119, %121 : vector<8x128xf32>
    %130 = arith.maximumf %123, %125 : vector<8x128xf32>
    %131 = arith.maximumf %129, %130 : vector<8x128xf32>
    %132 = vector.broadcast %115 : f32 to vector<8x128xf32>
    %133 = arith.subf %3, %132 : vector<8x128xf32>
    %134 = math.absf %133 : vector<8x128xf32>
    %135 = vector.broadcast %117 : f32 to vector<8x128xf32>
    %136 = arith.subf %5, %135 : vector<8x128xf32>
    %137 = math.absf %136 : vector<8x128xf32>
    %138 = arith.maximumf %134, %137 : vector<8x128xf32>
    %cst_28 = arith.constant 0.000000e+00 : f32
    %139 = vector.broadcast %cst_28 : f32 to vector<8x128xf32>
    %140 = arith.cmpf ogt, %128, %139 : vector<8x128xf32>
    %141 = arith.cmpf ogt, %131, %7 : vector<8x128xf32>
    %142 = arith.andi %140, %141 : vector<8x128xi1>
    %143 = arith.cmpf ole, %131, %9 : vector<8x128xf32>
    %144 = arith.andi %142, %143 : vector<8x128xi1>
    %145 = arith.cmpf olt, %138, %11 : vector<8x128xf32>
    %146 = arith.andi %144, %145 : vector<8x128xi1>
    %147 = vector.broadcast %113 : f32 to vector<8x128xf32>
    %148 = arith.cmpf olt, %147, %81 : vector<8x128xf32>
    %149 = arith.andi %146, %148 : vector<8x128xi1>
    %150 = vector.broadcast %113 : f32 to vector<8x128xf32>
    %151 = arith.select %149, %150, %81 : vector<8x128xi1>, vector<8x128xf32>
    %152 = arith.select %149, %119, %82 : vector<8x128xi1>, vector<8x128xf32>
    %153 = arith.select %149, %121, %83 : vector<8x128xi1>, vector<8x128xf32>
    %154 = arith.select %149, %123, %84 : vector<8x128xi1>, vector<8x128xf32>
    %155 = arith.select %149, %125, %85 : vector<8x128xi1>, vector<8x128xf32>
    %156 = vector.broadcast %110 : i32 to vector<8x128xi32>
    %157 = arith.select %149, %156, %87 : vector<8x128xi1>, vector<8x128xi32>
    %c2_i32_29 = arith.constant 2 : i32
    %c4_i32_30 = arith.constant 4 : i32
    %158 = arith.muli %arg1, %c4_i32_30 : i32
    %c0_i32_31 = arith.constant 0 : i32
    %159 = arith.addi %158, %c0_i32_31 : i32
    %160 = arith.index_cast %159 : i32 to index
    %161 = arith.index_cast %c2_i32_29 : i32 to index
    %162 = memref.load %arg2[%160, %161] : memref<8x8xf32, #tpu.memory_space<smem>>
    %c4_i32_32 = arith.constant 4 : i32
    %163 = arith.muli %arg1, %c4_i32_32 : i32
    %c1_i32_33 = arith.constant 1 : i32
    %164 = arith.addi %163, %c1_i32_33 : i32
    %165 = arith.index_cast %164 : i32 to index
    %166 = arith.index_cast %c2_i32_29 : i32 to index
    %167 = memref.load %arg2[%165, %166] : memref<8x8xf32, #tpu.memory_space<smem>>
    %c4_i32_34 = arith.constant 4 : i32
    %168 = arith.muli %arg1, %c4_i32_34 : i32
    %c2_i32_35 = arith.constant 2 : i32
    %169 = arith.addi %168, %c2_i32_35 : i32
    %170 = arith.index_cast %169 : i32 to index
    %171 = arith.index_cast %c2_i32_29 : i32 to index
    %172 = memref.load %arg2[%170, %171] : memref<8x8xf32, #tpu.memory_space<smem>>
    %c4_i32_36 = arith.constant 4 : i32
    %173 = arith.muli %arg1, %c4_i32_36 : i32
    %c3_i32_37 = arith.constant 3 : i32
    %174 = arith.addi %173, %c3_i32_37 : i32
    %175 = arith.index_cast %174 : i32 to index
    %176 = arith.index_cast %c2_i32_29 : i32 to index
    %177 = memref.load %arg2[%175, %176] : memref<8x8xf32, #tpu.memory_space<smem>>
    %178 = arith.index_cast %arg1 : i32 to index
    %179 = arith.index_cast %c2_i32_29 : i32 to index
    %180 = memref.load %arg3[%178, %179] : memref<2x8xi32, #tpu.memory_space<smem>>
    %181 = arith.subf %172, %162 : f32
    %182 = arith.subf %177, %167 : f32
    %183 = arith.mulf %181, %182 : f32
    %184 = arith.addf %162, %172 : f32
    %cst_38 = arith.constant 5.000000e-01 : f32
    %185 = arith.mulf %184, %cst_38 : f32
    %186 = arith.addf %167, %177 : f32
    %cst_39 = arith.constant 5.000000e-01 : f32
    %187 = arith.mulf %186, %cst_39 : f32
    %188 = vector.broadcast %162 : f32 to vector<8x128xf32>
    %189 = arith.subf %3, %188 : vector<8x128xf32>
    %190 = vector.broadcast %167 : f32 to vector<8x128xf32>
    %191 = arith.subf %5, %190 : vector<8x128xf32>
    %192 = vector.broadcast %172 : f32 to vector<8x128xf32>
    %193 = arith.subf %192, %3 : vector<8x128xf32>
    %194 = vector.broadcast %177 : f32 to vector<8x128xf32>
    %195 = arith.subf %194, %5 : vector<8x128xf32>
    %196 = arith.minimumf %189, %191 : vector<8x128xf32>
    %197 = arith.minimumf %193, %195 : vector<8x128xf32>
    %198 = arith.minimumf %196, %197 : vector<8x128xf32>
    %199 = arith.maximumf %189, %191 : vector<8x128xf32>
    %200 = arith.maximumf %193, %195 : vector<8x128xf32>
    %201 = arith.maximumf %199, %200 : vector<8x128xf32>
    %202 = vector.broadcast %185 : f32 to vector<8x128xf32>
    %203 = arith.subf %3, %202 : vector<8x128xf32>
    %204 = math.absf %203 : vector<8x128xf32>
    %205 = vector.broadcast %187 : f32 to vector<8x128xf32>
    %206 = arith.subf %5, %205 : vector<8x128xf32>
    %207 = math.absf %206 : vector<8x128xf32>
    %208 = arith.maximumf %204, %207 : vector<8x128xf32>
    %cst_40 = arith.constant 0.000000e+00 : f32
    %209 = vector.broadcast %cst_40 : f32 to vector<8x128xf32>
    %210 = arith.cmpf ogt, %198, %209 : vector<8x128xf32>
    %211 = arith.cmpf ogt, %201, %7 : vector<8x128xf32>
    %212 = arith.andi %210, %211 : vector<8x128xi1>
    %213 = arith.cmpf ole, %201, %9 : vector<8x128xf32>
    %214 = arith.andi %212, %213 : vector<8x128xi1>
    %215 = arith.cmpf olt, %208, %11 : vector<8x128xf32>
    %216 = arith.andi %214, %215 : vector<8x128xi1>
    %217 = vector.broadcast %183 : f32 to vector<8x128xf32>
    %218 = arith.cmpf olt, %217, %151 : vector<8x128xf32>
    %219 = arith.andi %216, %218 : vector<8x128xi1>
    %220 = vector.broadcast %183 : f32 to vector<8x128xf32>
    %221 = arith.select %219, %220, %151 : vector<8x128xi1>, vector<8x128xf32>
    %222 = arith.select %219, %189, %152 : vector<8x128xi1>, vector<8x128xf32>
    %223 = arith.select %219, %191, %153 : vector<8x128xi1>, vector<8x128xf32>
    %224 = arith.select %219, %193, %154 : vector<8x128xi1>, vector<8x128xf32>
    %225 = arith.select %219, %195, %155 : vector<8x128xi1>, vector<8x128xf32>
    %226 = vector.broadcast %180 : i32 to vector<8x128xi32>
    %227 = arith.select %219, %226, %157 : vector<8x128xi1>, vector<8x128xi32>
    %c3_i32_41 = arith.constant 3 : i32
    %c4_i32_42 = arith.constant 4 : i32
    %228 = arith.muli %arg1, %c4_i32_42 : i32
    %c0_i32_43 = arith.constant 0 : i32
    %229 = arith.addi %228, %c0_i32_43 : i32
    %230 = arith.index_cast %229 : i32 to index
    %231 = arith.index_cast %c3_i32_41 : i32 to index
    %232 = memref.load %arg2[%230, %231] : memref<8x8xf32, #tpu.memory_space<smem>>
    %c4_i32_44 = arith.constant 4 : i32
    %233 = arith.muli %arg1, %c4_i32_44 : i32
    %c1_i32_45 = arith.constant 1 : i32
    %234 = arith.addi %233, %c1_i32_45 : i32
    %235 = arith.index_cast %234 : i32 to index
    %236 = arith.index_cast %c3_i32_41 : i32 to index
    %237 = memref.load %arg2[%235, %236] : memref<8x8xf32, #tpu.memory_space<smem>>
    %c4_i32_46 = arith.constant 4 : i32
    %238 = arith.muli %arg1, %c4_i32_46 : i32
    %c2_i32_47 = arith.constant 2 : i32
    %239 = arith.addi %238, %c2_i32_47 : i32
    %240 = arith.index_cast %239 : i32 to index
    %241 = arith.index_cast %c3_i32_41 : i32 to index
    %242 = memref.load %arg2[%240, %241] : memref<8x8xf32, #tpu.memory_space<smem>>
    %c4_i32_48 = arith.constant 4 : i32
    %243 = arith.muli %arg1, %c4_i32_48 : i32
    %c3_i32_49 = arith.constant 3 : i32
    %244 = arith.addi %243, %c3_i32_49 : i32
    %245 = arith.index_cast %244 : i32 to index
    %246 = arith.index_cast %c3_i32_41 : i32 to index
    %247 = memref.load %arg2[%245, %246] : memref<8x8xf32, #tpu.memory_space<smem>>
    %248 = arith.index_cast %arg1 : i32 to index
    %249 = arith.index_cast %c3_i32_41 : i32 to index
    %250 = memref.load %arg3[%248, %249] : memref<2x8xi32, #tpu.memory_space<smem>>
    %251 = arith.subf %242, %232 : f32
    %252 = arith.subf %247, %237 : f32
    %253 = arith.mulf %251, %252 : f32
    %254 = arith.addf %232, %242 : f32
    %cst_50 = arith.constant 5.000000e-01 : f32
    %255 = arith.mulf %254, %cst_50 : f32
    %256 = arith.addf %237, %247 : f32
    %cst_51 = arith.constant 5.000000e-01 : f32
    %257 = arith.mulf %256, %cst_51 : f32
    %258 = vector.broadcast %232 : f32 to vector<8x128xf32>
    %259 = arith.subf %3, %258 : vector<8x128xf32>
    %260 = vector.broadcast %237 : f32 to vector<8x128xf32>
    %261 = arith.subf %5, %260 : vector<8x128xf32>
    %262 = vector.broadcast %242 : f32 to vector<8x128xf32>
    %263 = arith.subf %262, %3 : vector<8x128xf32>
    %264 = vector.broadcast %247 : f32 to vector<8x128xf32>
    %265 = arith.subf %264, %5 : vector<8x128xf32>
    %266 = arith.minimumf %259, %261 : vector<8x128xf32>
    %267 = arith.minimumf %263, %265 : vector<8x128xf32>
    %268 = arith.minimumf %266, %267 : vector<8x128xf32>
    %269 = arith.maximumf %259, %261 : vector<8x128xf32>
    %270 = arith.maximumf %263, %265 : vector<8x128xf32>
    %271 = arith.maximumf %269, %270 : vector<8x128xf32>
    %272 = vector.broadcast %255 : f32 to vector<8x128xf32>
    %273 = arith.subf %3, %272 : vector<8x128xf32>
    %274 = math.absf %273 : vector<8x128xf32>
    %275 = vector.broadcast %257 : f32 to vector<8x128xf32>
    %276 = arith.subf %5, %275 : vector<8x128xf32>
    %277 = math.absf %276 : vector<8x128xf32>
    %278 = arith.maximumf %274, %277 : vector<8x128xf32>
    %cst_52 = arith.constant 0.000000e+00 : f32
    %279 = vector.broadcast %cst_52 : f32 to vector<8x128xf32>
    %280 = arith.cmpf ogt, %268, %279 : vector<8x128xf32>
    %281 = arith.cmpf ogt, %271, %7 : vector<8x128xf32>
    %282 = arith.andi %280, %281 : vector<8x128xi1>
    %283 = arith.cmpf ole, %271, %9 : vector<8x128xf32>
    %284 = arith.andi %282, %283 : vector<8x128xi1>
    %285 = arith.cmpf olt, %278, %11 : vector<8x128xf32>
    %286 = arith.andi %284, %285 : vector<8x128xi1>
    %287 = vector.broadcast %253 : f32 to vector<8x128xf32>
    %288 = arith.cmpf olt, %287, %221 : vector<8x128xf32>
    %289 = arith.andi %286, %288 : vector<8x128xi1>
    %290 = vector.broadcast %253 : f32 to vector<8x128xf32>
    %291 = arith.select %289, %290, %221 : vector<8x128xi1>, vector<8x128xf32>
    %292 = arith.select %289, %259, %222 : vector<8x128xi1>, vector<8x128xf32>
    %293 = arith.select %289, %261, %223 : vector<8x128xi1>, vector<8x128xf32>
    %294 = arith.select %289, %263, %224 : vector<8x128xi1>, vector<8x128xf32>
    %295 = arith.select %289, %265, %225 : vector<8x128xi1>, vector<8x128xf32>
    %296 = vector.broadcast %250 : i32 to vector<8x128xi32>
    %297 = arith.select %289, %296, %227 : vector<8x128xi1>, vector<8x128xi32>
    %c4_i32_53 = arith.constant 4 : i32
    %c4_i32_54 = arith.constant 4 : i32
    %298 = arith.muli %arg1, %c4_i32_54 : i32
    %c0_i32_55 = arith.constant 0 : i32
    %299 = arith.addi %298, %c0_i32_55 : i32
    %300 = arith.index_cast %299 : i32 to index
    %301 = arith.index_cast %c4_i32_53 : i32 to index
    %302 = memref.load %arg2[%300, %301] : memref<8x8xf32, #tpu.memory_space<smem>>
    %c4_i32_56 = arith.constant 4 : i32
    %303 = arith.muli %arg1, %c4_i32_56 : i32
    %c1_i32_57 = arith.constant 1 : i32
    %304 = arith.addi %303, %c1_i32_57 : i32
    %305 = arith.index_cast %304 : i32 to index
    %306 = arith.index_cast %c4_i32_53 : i32 to index
    %307 = memref.load %arg2[%305, %306] : memref<8x8xf32, #tpu.memory_space<smem>>
    %c4_i32_58 = arith.constant 4 : i32
    %308 = arith.muli %arg1, %c4_i32_58 : i32
    %c2_i32_59 = arith.constant 2 : i32
    %309 = arith.addi %308, %c2_i32_59 : i32
    %310 = arith.index_cast %309 : i32 to index
    %311 = arith.index_cast %c4_i32_53 : i32 to index
    %312 = memref.load %arg2[%310, %311] : memref<8x8xf32, #tpu.memory_space<smem>>
    %c4_i32_60 = arith.constant 4 : i32
    %313 = arith.muli %arg1, %c4_i32_60 : i32
    %c3_i32_61 = arith.constant 3 : i32
    %314 = arith.addi %313, %c3_i32_61 : i32
    %315 = arith.index_cast %314 : i32 to index
    %316 = arith.index_cast %c4_i32_53 : i32 to index
    %317 = memref.load %arg2[%315, %316] : memref<8x8xf32, #tpu.memory_space<smem>>
    %318 = arith.index_cast %arg1 : i32 to index
    %319 = arith.index_cast %c4_i32_53 : i32 to index
    %320 = memref.load %arg3[%318, %319] : memref<2x8xi32, #tpu.memory_space<smem>>
    %321 = arith.subf %312, %302 : f32
    %322 = arith.subf %317, %307 : f32
    %323 = arith.mulf %321, %322 : f32
    %324 = arith.addf %302, %312 : f32
    %cst_62 = arith.constant 5.000000e-01 : f32
    %325 = arith.mulf %324, %cst_62 : f32
    %326 = arith.addf %307, %317 : f32
    %cst_63 = arith.constant 5.000000e-01 : f32
    %327 = arith.mulf %326, %cst_63 : f32
    %328 = vector.broadcast %302 : f32 to vector<8x128xf32>
    %329 = arith.subf %3, %328 : vector<8x128xf32>
    %330 = vector.broadcast %307 : f32 to vector<8x128xf32>
    %331 = arith.subf %5, %330 : vector<8x128xf32>
    %332 = vector.broadcast %312 : f32 to vector<8x128xf32>
    %333 = arith.subf %332, %3 : vector<8x128xf32>
    %334 = vector.broadcast %317 : f32 to vector<8x128xf32>
    %335 = arith.subf %334, %5 : vector<8x128xf32>
    %336 = arith.minimumf %329, %331 : vector<8x128xf32>
    %337 = arith.minimumf %333, %335 : vector<8x128xf32>
    %338 = arith.minimumf %336, %337 : vector<8x128xf32>
    %339 = arith.maximumf %329, %331 : vector<8x128xf32>
    %340 = arith.maximumf %333, %335 : vector<8x128xf32>
    %341 = arith.maximumf %339, %340 : vector<8x128xf32>
    %342 = vector.broadcast %325 : f32 to vector<8x128xf32>
    %343 = arith.subf %3, %342 : vector<8x128xf32>
    %344 = math.absf %343 : vector<8x128xf32>
    %345 = vector.broadcast %327 : f32 to vector<8x128xf32>
    %346 = arith.subf %5, %345 : vector<8x128xf32>
    %347 = math.absf %346 : vector<8x128xf32>
    %348 = arith.maximumf %344, %347 : vector<8x128xf32>
    %cst_64 = arith.constant 0.000000e+00 : f32
    %349 = vector.broadcast %cst_64 : f32 to vector<8x128xf32>
    %350 = arith.cmpf ogt, %338, %349 : vector<8x128xf32>
    %351 = arith.cmpf ogt, %341, %7 : vector<8x128xf32>
    %352 = arith.andi %350, %351 : vector<8x128xi1>
    %353 = arith.cmpf ole, %341, %9 : vector<8x128xf32>
    %354 = arith.andi %352, %353 : vector<8x128xi1>
    %355 = arith.cmpf olt, %348, %11 : vector<8x128xf32>
    %356 = arith.andi %354, %355 : vector<8x128xi1>
    %357 = vector.broadcast %323 : f32 to vector<8x128xf32>
    %358 = arith.cmpf olt, %357, %291 : vector<8x128xf32>
    %359 = arith.andi %356, %358 : vector<8x128xi1>
    %360 = vector.broadcast %323 : f32 to vector<8x128xf32>
    %361 = arith.select %359, %360, %291 : vector<8x128xi1>, vector<8x128xf32>
    %362 = arith.select %359, %329, %292 : vector<8x128xi1>, vector<8x128xf32>
    %363 = arith.select %359, %331, %293 : vector<8x128xi1>, vector<8x128xf32>
    %364 = arith.select %359, %333, %294 : vector<8x128xi1>, vector<8x128xf32>
    %365 = arith.select %359, %335, %295 : vector<8x128xi1>, vector<8x128xf32>
    %366 = vector.broadcast %320 : i32 to vector<8x128xi32>
    %367 = arith.select %359, %366, %297 : vector<8x128xi1>, vector<8x128xi32>
    %c5_i32 = arith.constant 5 : i32
    %c4_i32_65 = arith.constant 4 : i32
    %368 = arith.muli %arg1, %c4_i32_65 : i32
    %c0_i32_66 = arith.constant 0 : i32
    %369 = arith.addi %368, %c0_i32_66 : i32
    %370 = arith.index_cast %369 : i32 to index
    %371 = arith.index_cast %c5_i32 : i32 to index
    %372 = memref.load %arg2[%370, %371] : memref<8x8xf32, #tpu.memory_space<smem>>
    %c4_i32_67 = arith.constant 4 : i32
    %373 = arith.muli %arg1, %c4_i32_67 : i32
    %c1_i32_68 = arith.constant 1 : i32
    %374 = arith.addi %373, %c1_i32_68 : i32
    %375 = arith.index_cast %374 : i32 to index
    %376 = arith.index_cast %c5_i32 : i32 to index
    %377 = memref.load %arg2[%375, %376] : memref<8x8xf32, #tpu.memory_space<smem>>
    %c4_i32_69 = arith.constant 4 : i32
    %378 = arith.muli %arg1, %c4_i32_69 : i32
    %c2_i32_70 = arith.constant 2 : i32
    %379 = arith.addi %378, %c2_i32_70 : i32
    %380 = arith.index_cast %379 : i32 to index
    %381 = arith.index_cast %c5_i32 : i32 to index
    %382 = memref.load %arg2[%380, %381] : memref<8x8xf32, #tpu.memory_space<smem>>
    %c4_i32_71 = arith.constant 4 : i32
    %383 = arith.muli %arg1, %c4_i32_71 : i32
    %c3_i32_72 = arith.constant 3 : i32
    %384 = arith.addi %383, %c3_i32_72 : i32
    %385 = arith.index_cast %384 : i32 to index
    %386 = arith.index_cast %c5_i32 : i32 to index
    %387 = memref.load %arg2[%385, %386] : memref<8x8xf32, #tpu.memory_space<smem>>
    %388 = arith.index_cast %arg1 : i32 to index
    %389 = arith.index_cast %c5_i32 : i32 to index
    %390 = memref.load %arg3[%388, %389] : memref<2x8xi32, #tpu.memory_space<smem>>
    %391 = arith.subf %382, %372 : f32
    %392 = arith.subf %387, %377 : f32
    %393 = arith.mulf %391, %392 : f32
    %394 = arith.addf %372, %382 : f32
    %cst_73 = arith.constant 5.000000e-01 : f32
    %395 = arith.mulf %394, %cst_73 : f32
    %396 = arith.addf %377, %387 : f32
    %cst_74 = arith.constant 5.000000e-01 : f32
    %397 = arith.mulf %396, %cst_74 : f32
    %398 = vector.broadcast %372 : f32 to vector<8x128xf32>
    %399 = arith.subf %3, %398 : vector<8x128xf32>
    %400 = vector.broadcast %377 : f32 to vector<8x128xf32>
    %401 = arith.subf %5, %400 : vector<8x128xf32>
    %402 = vector.broadcast %382 : f32 to vector<8x128xf32>
    %403 = arith.subf %402, %3 : vector<8x128xf32>
    %404 = vector.broadcast %387 : f32 to vector<8x128xf32>
    %405 = arith.subf %404, %5 : vector<8x128xf32>
    %406 = arith.minimumf %399, %401 : vector<8x128xf32>
    %407 = arith.minimumf %403, %405 : vector<8x128xf32>
    %408 = arith.minimumf %406, %407 : vector<8x128xf32>
    %409 = arith.maximumf %399, %401 : vector<8x128xf32>
    %410 = arith.maximumf %403, %405 : vector<8x128xf32>
    %411 = arith.maximumf %409, %410 : vector<8x128xf32>
    %412 = vector.broadcast %395 : f32 to vector<8x128xf32>
    %413 = arith.subf %3, %412 : vector<8x128xf32>
    %414 = math.absf %413 : vector<8x128xf32>
    %415 = vector.broadcast %397 : f32 to vector<8x128xf32>
    %416 = arith.subf %5, %415 : vector<8x128xf32>
    %417 = math.absf %416 : vector<8x128xf32>
    %418 = arith.maximumf %414, %417 : vector<8x128xf32>
    %cst_75 = arith.constant 0.000000e+00 : f32
    %419 = vector.broadcast %cst_75 : f32 to vector<8x128xf32>
    %420 = arith.cmpf ogt, %408, %419 : vector<8x128xf32>
    %421 = arith.cmpf ogt, %411, %7 : vector<8x128xf32>
    %422 = arith.andi %420, %421 : vector<8x128xi1>
    %423 = arith.cmpf ole, %411, %9 : vector<8x128xf32>
    %424 = arith.andi %422, %423 : vector<8x128xi1>
    %425 = arith.cmpf olt, %418, %11 : vector<8x128xf32>
    %426 = arith.andi %424, %425 : vector<8x128xi1>
    %427 = vector.broadcast %393 : f32 to vector<8x128xf32>
    %428 = arith.cmpf olt, %427, %361 : vector<8x128xf32>
    %429 = arith.andi %426, %428 : vector<8x128xi1>
    %430 = vector.broadcast %393 : f32 to vector<8x128xf32>
    %431 = arith.select %429, %430, %361 : vector<8x128xi1>, vector<8x128xf32>
    %432 = arith.select %429, %399, %362 : vector<8x128xi1>, vector<8x128xf32>
    %433 = arith.select %429, %401, %363 : vector<8x128xi1>, vector<8x128xf32>
    %434 = arith.select %429, %403, %364 : vector<8x128xi1>, vector<8x128xf32>
    %435 = arith.select %429, %405, %365 : vector<8x128xi1>, vector<8x128xf32>
    %436 = vector.broadcast %390 : i32 to vector<8x128xi32>
    %437 = arith.select %429, %436, %367 : vector<8x128xi1>, vector<8x128xi32>
    %c6_i32 = arith.constant 6 : i32
    %c4_i32_76 = arith.constant 4 : i32
    %438 = arith.muli %arg1, %c4_i32_76 : i32
    %c0_i32_77 = arith.constant 0 : i32
    %439 = arith.addi %438, %c0_i32_77 : i32
    %440 = arith.index_cast %439 : i32 to index
    %441 = arith.index_cast %c6_i32 : i32 to index
    %442 = memref.load %arg2[%440, %441] : memref<8x8xf32, #tpu.memory_space<smem>>
    %c4_i32_78 = arith.constant 4 : i32
    %443 = arith.muli %arg1, %c4_i32_78 : i32
    %c1_i32_79 = arith.constant 1 : i32
    %444 = arith.addi %443, %c1_i32_79 : i32
    %445 = arith.index_cast %444 : i32 to index
    %446 = arith.index_cast %c6_i32 : i32 to index
    %447 = memref.load %arg2[%445, %446] : memref<8x8xf32, #tpu.memory_space<smem>>
    %c4_i32_80 = arith.constant 4 : i32
    %448 = arith.muli %arg1, %c4_i32_80 : i32
    %c2_i32_81 = arith.constant 2 : i32
    %449 = arith.addi %448, %c2_i32_81 : i32
    %450 = arith.index_cast %449 : i32 to index
    %451 = arith.index_cast %c6_i32 : i32 to index
    %452 = memref.load %arg2[%450, %451] : memref<8x8xf32, #tpu.memory_space<smem>>
    %c4_i32_82 = arith.constant 4 : i32
    %453 = arith.muli %arg1, %c4_i32_82 : i32
    %c3_i32_83 = arith.constant 3 : i32
    %454 = arith.addi %453, %c3_i32_83 : i32
    %455 = arith.index_cast %454 : i32 to index
    %456 = arith.index_cast %c6_i32 : i32 to index
    %457 = memref.load %arg2[%455, %456] : memref<8x8xf32, #tpu.memory_space<smem>>
    %458 = arith.index_cast %arg1 : i32 to index
    %459 = arith.index_cast %c6_i32 : i32 to index
    %460 = memref.load %arg3[%458, %459] : memref<2x8xi32, #tpu.memory_space<smem>>
    %461 = arith.subf %452, %442 : f32
    %462 = arith.subf %457, %447 : f32
    %463 = arith.mulf %461, %462 : f32
    %464 = arith.addf %442, %452 : f32
    %cst_84 = arith.constant 5.000000e-01 : f32
    %465 = arith.mulf %464, %cst_84 : f32
    %466 = arith.addf %447, %457 : f32
    %cst_85 = arith.constant 5.000000e-01 : f32
    %467 = arith.mulf %466, %cst_85 : f32
    %468 = vector.broadcast %442 : f32 to vector<8x128xf32>
    %469 = arith.subf %3, %468 : vector<8x128xf32>
    %470 = vector.broadcast %447 : f32 to vector<8x128xf32>
    %471 = arith.subf %5, %470 : vector<8x128xf32>
    %472 = vector.broadcast %452 : f32 to vector<8x128xf32>
    %473 = arith.subf %472, %3 : vector<8x128xf32>
    %474 = vector.broadcast %457 : f32 to vector<8x128xf32>
    %475 = arith.subf %474, %5 : vector<8x128xf32>
    %476 = arith.minimumf %469, %471 : vector<8x128xf32>
    %477 = arith.minimumf %473, %475 : vector<8x128xf32>
    %478 = arith.minimumf %476, %477 : vector<8x128xf32>
    %479 = arith.maximumf %469, %471 : vector<8x128xf32>
    %480 = arith.maximumf %473, %475 : vector<8x128xf32>
    %481 = arith.maximumf %479, %480 : vector<8x128xf32>
    %482 = vector.broadcast %465 : f32 to vector<8x128xf32>
    %483 = arith.subf %3, %482 : vector<8x128xf32>
    %484 = math.absf %483 : vector<8x128xf32>
    %485 = vector.broadcast %467 : f32 to vector<8x128xf32>
    %486 = arith.subf %5, %485 : vector<8x128xf32>
    %487 = math.absf %486 : vector<8x128xf32>
    %488 = arith.maximumf %484, %487 : vector<8x128xf32>
    %cst_86 = arith.constant 0.000000e+00 : f32
    %489 = vector.broadcast %cst_86 : f32 to vector<8x128xf32>
    %490 = arith.cmpf ogt, %478, %489 : vector<8x128xf32>
    %491 = arith.cmpf ogt, %481, %7 : vector<8x128xf32>
    %492 = arith.andi %490, %491 : vector<8x128xi1>
    %493 = arith.cmpf ole, %481, %9 : vector<8x128xf32>
    %494 = arith.andi %492, %493 : vector<8x128xi1>
    %495 = arith.cmpf olt, %488, %11 : vector<8x128xf32>
    %496 = arith.andi %494, %495 : vector<8x128xi1>
    %497 = vector.broadcast %463 : f32 to vector<8x128xf32>
    %498 = arith.cmpf olt, %497, %431 : vector<8x128xf32>
    %499 = arith.andi %496, %498 : vector<8x128xi1>
    %500 = vector.broadcast %463 : f32 to vector<8x128xf32>
    %501 = arith.select %499, %500, %431 : vector<8x128xi1>, vector<8x128xf32>
    %502 = arith.select %499, %469, %432 : vector<8x128xi1>, vector<8x128xf32>
    %503 = arith.select %499, %471, %433 : vector<8x128xi1>, vector<8x128xf32>
    %504 = arith.select %499, %473, %434 : vector<8x128xi1>, vector<8x128xf32>
    %505 = arith.select %499, %475, %435 : vector<8x128xi1>, vector<8x128xf32>
    %506 = vector.broadcast %460 : i32 to vector<8x128xi32>
    %507 = arith.select %499, %506, %437 : vector<8x128xi1>, vector<8x128xi32>
    %c7_i32 = arith.constant 7 : i32
    %c4_i32_87 = arith.constant 4 : i32
    %508 = arith.muli %arg1, %c4_i32_87 : i32
    %c0_i32_88 = arith.constant 0 : i32
    %509 = arith.addi %508, %c0_i32_88 : i32
    %510 = arith.index_cast %509 : i32 to index
    %511 = arith.index_cast %c7_i32 : i32 to index
    %512 = memref.load %arg2[%510, %511] : memref<8x8xf32, #tpu.memory_space<smem>>
    %c4_i32_89 = arith.constant 4 : i32
    %513 = arith.muli %arg1, %c4_i32_89 : i32
    %c1_i32_90 = arith.constant 1 : i32
    %514 = arith.addi %513, %c1_i32_90 : i32
    %515 = arith.index_cast %514 : i32 to index
    %516 = arith.index_cast %c7_i32 : i32 to index
    %517 = memref.load %arg2[%515, %516] : memref<8x8xf32, #tpu.memory_space<smem>>
    %c4_i32_91 = arith.constant 4 : i32
    %518 = arith.muli %arg1, %c4_i32_91 : i32
    %c2_i32_92 = arith.constant 2 : i32
    %519 = arith.addi %518, %c2_i32_92 : i32
    %520 = arith.index_cast %519 : i32 to index
    %521 = arith.index_cast %c7_i32 : i32 to index
    %522 = memref.load %arg2[%520, %521] : memref<8x8xf32, #tpu.memory_space<smem>>
    %c4_i32_93 = arith.constant 4 : i32
    %523 = arith.muli %arg1, %c4_i32_93 : i32
    %c3_i32_94 = arith.constant 3 : i32
    %524 = arith.addi %523, %c3_i32_94 : i32
    %525 = arith.index_cast %524 : i32 to index
    %526 = arith.index_cast %c7_i32 : i32 to index
    %527 = memref.load %arg2[%525, %526] : memref<8x8xf32, #tpu.memory_space<smem>>
    %528 = arith.index_cast %arg1 : i32 to index
    %529 = arith.index_cast %c7_i32 : i32 to index
    %530 = memref.load %arg3[%528, %529] : memref<2x8xi32, #tpu.memory_space<smem>>
    %531 = arith.subf %522, %512 : f32
    %532 = arith.subf %527, %517 : f32
    %533 = arith.mulf %531, %532 : f32
    %534 = arith.addf %512, %522 : f32
    %cst_95 = arith.constant 5.000000e-01 : f32
    %535 = arith.mulf %534, %cst_95 : f32
    %536 = arith.addf %517, %527 : f32
    %cst_96 = arith.constant 5.000000e-01 : f32
    %537 = arith.mulf %536, %cst_96 : f32
    %538 = vector.broadcast %512 : f32 to vector<8x128xf32>
    %539 = arith.subf %3, %538 : vector<8x128xf32>
    %540 = vector.broadcast %517 : f32 to vector<8x128xf32>
    %541 = arith.subf %5, %540 : vector<8x128xf32>
    %542 = vector.broadcast %522 : f32 to vector<8x128xf32>
    %543 = arith.subf %542, %3 : vector<8x128xf32>
    %544 = vector.broadcast %527 : f32 to vector<8x128xf32>
    %545 = arith.subf %544, %5 : vector<8x128xf32>
    %546 = arith.minimumf %539, %541 : vector<8x128xf32>
    %547 = arith.minimumf %543, %545 : vector<8x128xf32>
    %548 = arith.minimumf %546, %547 : vector<8x128xf32>
    %549 = arith.maximumf %539, %541 : vector<8x128xf32>
    %550 = arith.maximumf %543, %545 : vector<8x128xf32>
    %551 = arith.maximumf %549, %550 : vector<8x128xf32>
    %552 = vector.broadcast %535 : f32 to vector<8x128xf32>
    %553 = arith.subf %3, %552 : vector<8x128xf32>
    %554 = math.absf %553 : vector<8x128xf32>
    %555 = vector.broadcast %537 : f32 to vector<8x128xf32>
    %556 = arith.subf %5, %555 : vector<8x128xf32>
    %557 = math.absf %556 : vector<8x128xf32>
    %558 = arith.maximumf %554, %557 : vector<8x128xf32>
    %cst_97 = arith.constant 0.000000e+00 : f32
    %559 = vector.broadcast %cst_97 : f32 to vector<8x128xf32>
    %560 = arith.cmpf ogt, %548, %559 : vector<8x128xf32>
    %561 = arith.cmpf ogt, %551, %7 : vector<8x128xf32>
    %562 = arith.andi %560, %561 : vector<8x128xi1>
    %563 = arith.cmpf ole, %551, %9 : vector<8x128xf32>
    %564 = arith.andi %562, %563 : vector<8x128xi1>
    %565 = arith.cmpf olt, %558, %11 : vector<8x128xf32>
    %566 = arith.andi %564, %565 : vector<8x128xi1>
    %567 = vector.broadcast %533 : f32 to vector<8x128xf32>
    %568 = arith.cmpf olt, %567, %501 : vector<8x128xf32>
    %569 = arith.andi %566, %568 : vector<8x128xi1>
    %570 = vector.broadcast %533 : f32 to vector<8x128xf32>
    %571 = arith.select %569, %570, %501 : vector<8x128xi1>, vector<8x128xf32>
    %572 = arith.select %569, %539, %502 : vector<8x128xi1>, vector<8x128xf32>
    %573 = arith.select %569, %541, %503 : vector<8x128xi1>, vector<8x128xf32>
    %574 = arith.select %569, %543, %504 : vector<8x128xi1>, vector<8x128xf32>
    %575 = arith.select %569, %545, %505 : vector<8x128xi1>, vector<8x128xf32>
    %576 = vector.broadcast %530 : i32 to vector<8x128xi32>
    %577 = arith.select %569, %576, %507 : vector<8x128xi1>, vector<8x128xi32>
    %c8_i32_98 = arith.constant 8 : i32
    %578 = vector.broadcast %cst : f32 to vector<8x128xf32>
    %579 = arith.cmpf olt, %571, %578 : vector<8x128xf32>
    %580 = arith.minimumf %572, %574 : vector<8x128xf32>
    %581 = arith.maximumf %572, %574 : vector<8x128xf32>
    %582 = arith.minimumf %573, %575 : vector<8x128xf32>
    %583 = arith.maximumf %573, %575 : vector<8x128xf32>
    %584 = arith.mulf %580, %582 : vector<8x128xf32>
    %585 = arith.mulf %581, %583 : vector<8x128xf32>
    %cst_99 = arith.constant 1.000000e-10 : f32
    %586 = vector.broadcast %cst_99 : f32 to vector<8x128xf32>
    %587 = arith.addf %585, %586 : vector<8x128xf32>
    %588 = arith.divf %584, %587 : vector<8x128xf32>
    %589 = math.sqrt %588 : vector<8x128xf32>
    %c0_i32_100 = arith.constant 0 : i32
    %590 = vector.broadcast %c0_i32_100 : i32 to vector<8x128xi32>
    %591 = arith.select %579, %577, %590 : vector<8x128xi1>, vector<8x128xi32>
    %c0_101 = arith.constant 0 : index
    %592 = arith.index_cast %1 : i32 to index
    %c0_102 = arith.constant 0 : index
    %593 = vector.load %arg9[%c0_101, %592, %c0_102] : memref<1x8x128xi32, #tpu.memory_space<vmem>>, vector<1x8x128xi32>
    %594 = vector.shape_cast %593 : vector<1x8x128xi32> to vector<8x128xi32>
    %595 = vector.shape_cast %591 : vector<8x128xi32> to vector<1x8x128xi32>
    tpu.vector_store %arg9[%c0_101, %592, %c0_102], %595 {strides = array<i32>} : memref<1x8x128xi32, #tpu.memory_space<vmem>>, vector<1x8x128xi32>,
    %cst_103 = arith.constant -1.000000e+00 : f32
    %596 = vector.broadcast %cst_103 : f32 to vector<8x128xf32>
    %597 = arith.select %579, %589, %596 : vector<8x128xi1>, vector<8x128xf32>
    %c0_104 = arith.constant 0 : index
    %598 = arith.index_cast %1 : i32 to index
    %c0_105 = arith.constant 0 : index
    %599 = vector.load %arg10[%c0_104, %598, %c0_105] : memref<1x8x128xf32, #tpu.memory_space<vmem>>, vector<1x8x128xf32>
    %600 = vector.shape_cast %599 : vector<1x8x128xf32> to vector<8x128xf32>
    %601 = vector.shape_cast %597 : vector<8x128xf32> to vector<1x8x128xf32>
    tpu.vector_store %arg10[%c0_104, %598, %c0_105], %601 {strides = array<i32>} : memref<1x8x128xf32, #tpu.memory_space<vmem>>, vector<1x8x128xf32>,
    %cst_106 = arith.constant -1.000000e+00 : f32
    %602 = vector.broadcast %cst_106 : f32 to vector<8x128xf32>
    %603 = arith.select %579, %572, %602 : vector<8x128xi1>, vector<8x128xf32>
    %c0_107 = arith.constant 0 : index
    %c0_108 = arith.constant 0 : index
    %604 = arith.index_cast %1 : i32 to index
    %c0_109 = arith.constant 0 : index
    %605 = vector.load %arg11[%c0_107, %c0_108, %604, %c0_109] : memref<1x4x8x128xf32, #tpu.memory_space<vmem>>, vector<1x1x8x128xf32>
    %606 = vector.shape_cast %605 : vector<1x1x8x128xf32> to vector<8x128xf32>
    %607 = vector.shape_cast %603 : vector<8x128xf32> to vector<1x1x8x128xf32>
    tpu.vector_store %arg11[%c0_107, %c0_108, %604, %c0_109], %607 {strides = array<i32>} : memref<1x4x8x128xf32, #tpu.memory_space<vmem>>, vector<1x1x8x128xf32>,
    %cst_110 = arith.constant -1.000000e+00 : f32
    %608 = vector.broadcast %cst_110 : f32 to vector<8x128xf32>
    %609 = arith.select %579, %573, %608 : vector<8x128xi1>, vector<8x128xf32>
    %c0_111 = arith.constant 0 : index
    %c1 = arith.constant 1 : index
    %610 = arith.index_cast %1 : i32 to index
    %c0_112 = arith.constant 0 : index
    %611 = vector.load %arg11[%c0_111, %c1, %610, %c0_112] : memref<1x4x8x128xf32, #tpu.memory_space<vmem>>, vector<1x1x8x128xf32>
    %612 = vector.shape_cast %611 : vector<1x1x8x128xf32> to vector<8x128xf32>
    %613 = vector.shape_cast %609 : vector<8x128xf32> to vector<1x1x8x128xf32>
    tpu.vector_store %arg11[%c0_111, %c1, %610, %c0_112], %613 {strides = array<i32>} : memref<1x4x8x128xf32, #tpu.memory_space<vmem>>, vector<1x1x8x128xf32>,
    %cst_113 = arith.constant -1.000000e+00 : f32
    %614 = vector.broadcast %cst_113 : f32 to vector<8x128xf32>
    %615 = arith.select %579, %574, %614 : vector<8x128xi1>, vector<8x128xf32>
    %c0_114 = arith.constant 0 : index
    %c2 = arith.constant 2 : index
    %616 = arith.index_cast %1 : i32 to index
    %c0_115 = arith.constant 0 : index
    %617 = vector.load %arg11[%c0_114, %c2, %616, %c0_115] : memref<1x4x8x128xf32, #tpu.memory_space<vmem>>, vector<1x1x8x128xf32>
    %618 = vector.shape_cast %617 : vector<1x1x8x128xf32> to vector<8x128xf32>
    %619 = vector.shape_cast %615 : vector<8x128xf32> to vector<1x1x8x128xf32>
    tpu.vector_store %arg11[%c0_114, %c2, %616, %c0_115], %619 {strides = array<i32>} : memref<1x4x8x128xf32, #tpu.memory_space<vmem>>, vector<1x1x8x128xf32>,
    %cst_116 = arith.constant -1.000000e+00 : f32
    %620 = vector.broadcast %cst_116 : f32 to vector<8x128xf32>
    %621 = arith.select %579, %575, %620 : vector<8x128xi1>, vector<8x128xf32>
    %c0_117 = arith.constant 0 : index
    %c3 = arith.constant 3 : index
    %622 = arith.index_cast %1 : i32 to index
    %c0_118 = arith.constant 0 : index
    %623 = vector.load %arg11[%c0_117, %c3, %622, %c0_118] : memref<1x4x8x128xf32, #tpu.memory_space<vmem>>, vector<1x1x8x128xf32>
    %624 = vector.shape_cast %623 : vector<1x1x8x128xf32> to vector<8x128xf32>
    %625 = vector.shape_cast %621 : vector<8x128xf32> to vector<1x1x8x128xf32>
    tpu.vector_store %arg11[%c0_117, %c3, %622, %c0_118], %625 {strides = array<i32>} : memref<1x4x8x128xf32, #tpu.memory_space<vmem>>, vector<1x1x8x128xf32>,
    %c1_i32_119 = arith.constant 1 : i32
    return
  }
  func.func @transform_0(%arg0: i32, %arg1: i32, %arg2: memref<8x8xf32, #tpu.memory_space<smem>>, %arg3: memref<2x8xi32, #tpu.memory_space<smem>>) -> (i32, i32) {
    %c0_i32 = arith.constant 0 : i32
    %c0_i32_0 = arith.constant 0 : i32
    return %arg0, %c0_i32 : i32, i32
  }
  func.func @transform_1(%arg0: i32, %arg1: i32, %arg2: memref<8x8xf32, #tpu.memory_space<smem>>, %arg3: memref<2x8xi32, #tpu.memory_space<smem>>) -> (i32, i32) {
    %c0_i32 = arith.constant 0 : i32
    %c0_i32_0 = arith.constant 0 : i32
    return %arg0, %c0_i32 : i32, i32
  }
  func.func @transform_2(%arg0: i32, %arg1: i32, %arg2: memref<8x8xf32, #tpu.memory_space<smem>>, %arg3: memref<2x8xi32, #tpu.memory_space<smem>>) -> (i32, i32) {
    %c0_i32 = arith.constant 0 : i32
    %c0_i32_0 = arith.constant 0 : i32
    return %arg0, %c0_i32 : i32, i32
  }
  func.func @transform_3(%arg0: i32, %arg1: i32, %arg2: memref<8x8xf32, #tpu.memory_space<smem>>, %arg3: memref<2x8xi32, #tpu.memory_space<smem>>) -> (i32, i32) {
    %c0_i32 = arith.constant 0 : i32
    %c0_i32_0 = arith.constant 0 : i32
    return %arg0, %c0_i32 : i32, i32
  }
  func.func @transform_4(%arg0: i32, %arg1: i32, %arg2: memref<8x8xf32, #tpu.memory_space<smem>>, %arg3: memref<2x8xi32, #tpu.memory_space<smem>>) -> (i32, i32) {
    %c0_i32 = arith.constant 0 : i32
    %c0_i32_0 = arith.constant 0 : i32
    return %arg0, %c0_i32 : i32, i32
  }
  func.func @transform_5(%arg0: i32, %arg1: i32, %arg2: memref<8x8xf32, #tpu.memory_space<smem>>, %arg3: memref<2x8xi32, #tpu.memory_space<smem>>) -> (i32, i32, i32) {
    %c0_i32 = arith.constant 0 : i32
    %c0_i32_0 = arith.constant 0 : i32
    return %arg1, %arg0, %c0_i32 : i32, i32, i32
  }
  func.func @transform_6(%arg0: i32, %arg1: i32, %arg2: memref<8x8xf32, #tpu.memory_space<smem>>, %arg3: memref<2x8xi32, #tpu.memory_space<smem>>) -> (i32, i32, i32) {
    %c0_i32 = arith.constant 0 : i32
    %c0_i32_0 = arith.constant 0 : i32
    return %arg1, %arg0, %c0_i32 : i32, i32, i32
  }
  func.func @transform_7(%arg0: i32, %arg1: i32, %arg2: memref<8x8xf32, #tpu.memory_space<smem>>, %arg3: memref<2x8xi32, #tpu.memory_space<smem>>) -> (i32, i32, i32, i32) {
    %c0_i32 = arith.constant 0 : i32
    %c0_i32_0 = arith.constant 0 : i32
    %c0_i32_1 = arith.constant 0 : i32
    return %arg1, %c0_i32, %arg0, %c0_i32_0 : i32, i32, i32, i32
  }
}

</mosaic_0001>

<bundles_post_ra>
// kernel: tpu_custom_call.1
= control target key start
LH: loop header
LB: loop body
LE: loop exit
PB: predicated region body
PF: predicated region fallthrough
CT: control target
= control target key end

     0   :  { %s2697_s0 = inlined_call_operand.hbm [shape: f32[8,8], index: 0, kind: input, shape index: {}]   ;;  %s2698_s2 = inlined_call_operand.hbm [shape: f32[8,128], index: 2, kind: input, shape index: {}]   ;;  %s2699_s3 = inlined_call_operand.vmem [shape: f32[8,128], index: 3, kind: input, shape index: {}]   ;;  %s2700_s4 = inlined_call_operand.hbm [shape: f32[8,128], index: 4, kind: input, shape index: {}]   ;;  %s2701_s5 = inlined_call_operand.vmem [shape: f32[8,128], index: 5, kind: input, shape index: {}]   ;;  %s2702_s6 = inlined_call_operand.hbm [shape: f32[8,128], index: 6, kind: input, shape index: {}]   ;;  %s2703_s7 = inlined_call_operand.hbm [shape: s32[2,8,128], index: 7, kind: output, shape index: {0}]   ;;  %s2704_s8 = inlined_call_operand.hbm [shape: f32[2,8,128], index: 8, kind: output, shape index: {1}]   ;;  %s2705_s9 = inlined_call_operand.hbm [shape: f32[2,4,8,128], index: 9, kind: output, shape index: {2}]   ;;  %s2706_s1 = inlined_call_operand.vmem [shape: s32[2,8], index: 1, kind: input, shape index: {}]  }
   0x1   :  { %2715 = sst [smem:[#allocation25_spill]] %s2698_s2  ;;  %s1274_s11 = scalar_lea.hbm %s2697_s0, 128 }
   0x2   :  { %2716 = sst [smem:[#allocation26_spill]] %s2699_s3  ;;  %p1275_p0 = scmp.ne.s32.totalorder %s2697_s0, %s1274_s11 }
   0x3   :  { %2717 = sst [smem:[#allocation27_spill]] %s2700_s4  ;;  %p1278_p1 = scmp.lt.u32.totalorder %s1274_s11, %s2697_s0 }
   0x4   :  { %2718 = sst [smem:[#allocation28_spill]] %s2702_s6 }
   0x5   :  { %p1280_p2 = pnand %p1278_p1, %p1275_p0 }
   0x7   :  { %1283 = shalt.err (!%p1280_p2)  }
   0x8   :  { %s1530_s16 = smov [#allocation3]   ;;  %s17_s21 = sshll.u32 %s2706_s1, 4  ;;  %s18_s21 = int_to_ptr.vmem [resolvable:$true] %s17_s21 }
   0x9   :  { %16 = dma.hbm_to_smem %s2697_s0, 128, %s1530_s16, [#allocation2] }
   0xa   :  { %s1284_s22 = scalar_lea.vmem %s18_s21, 32  ;;  %p1289_p4 = scmp.lt.s32.totalorder %s18_s21, %s18_s21 }
   0xb   :  { %p1285_p3 = scmp.ne.s32.totalorder %s18_s21, %s1284_s22  ;;  %p1290_p5 = scmp.lt.s32.totalorder %s1284_s22, %s1284_s22 }
   0xd   :  { %p1291_p6 = por %p1290_p5, %p1289_p4 }
   0xf   :  { %p1292_p7 = pnand %p1291_p6, %p1285_p3 }
  0x11   :  { %1295 = shalt.err (!%p1292_p7)  }
  0x12   :  { %s1531_s23 = smov [#allocation4]  }
  0x13   :  { %20 = dma.vmem_to_smem %s18_s21, 32, %s1531_s23, [#allocation2] }
  0x14   :  { %1488 = dma.done.wait [#allocation2], 160 }
  0x15   :  { %1489 = vsyncadd [#allocation2], 4294967136 }
  0x16   :  { %22 = sfence }
  0x17   :  { %23 = vsyncpa [#allocation6], 0 }
  0x18   :  { %24 = vsyncpa [#allocation9], 0 }
  0x19   :  { %25 = vsyncpa [#allocation7], 0 }
  0x1a   :  { %27 = vsyncpa [#allocation7 + $0x1], 0 }
  0x1b   :  { %28 = vsyncpa [#allocation13], 0 }
  0x1c   :  { %30 = vsyncpa [#allocation13 + $0x1], 0  ;;  %s1605_s0 = smov 0   ;;  %s1607_s1 = smov 0  }
  0x1d   :  { %s1609_s24 = smov 0   ;;  %s1611_s25 = smov 0  }
  0x1e   :  { %s1613_s26 = smov 0   ;;  %s1615_s27 = smov 0  }
  0x1f LB: > { %2719 = sst [smem:[#allocation20_spill]] %s1516_s24  ;;  %s1636_s28 = sadd.s32 4294967295, %s1528_s27   ;;  %s1528_s27 = sphi %s1615_s27, %s36_s27   ;;  %s1524_s26 = sphi %s1613_s26, %s2783_s26   ;;  %s1520_s25 = sphi %s1611_s25, %s2782_s25   ;;  %s1516_s24 = sphi %s1609_s24, %s2781_s24   ;;  %s1512_s1 = sphi %s1607_s1, %s2785_s1   ;;  %s1508_s0 = sphi %s1605_s0, %s2784_s0  }
  0x20   : > { %2720 = sst [smem:[#allocation21_spill]] %s1524_s26  ;;  %s2707_s29 = sadd.s32 4294967294, %s1528_s27  }
  0x21   : > { %s45_s30 = sadd.s32 1, %s1524_s26  ;;  %s187_s10 = sadd.s32 1, %s1516_s24 }
  0x22   : > { %p46_p8 = scmp.ge.s32.totalorder %s45_s30, 2  ;;  %p197_p9 = scmp.ne.s32.totalorder %s1516_s24, %s1512_s1 }
  0x23   : > { %p198_p10 = scmp.eq.s32.totalorder %s1636_s28, 1  ;;  %p203_p11 = scmp.ne.s32.totalorder %s1512_s1, %s1508_s0 }
  0x24   : > { %s2787_s30 = smov (%p46_p8, %s45_s30), 0  ;;  %p204_p13 = scmp.eq.s32.totalorder %s2707_s29, 1 }
  0x25   : > { %2721 = sst [smem:[#allocation22_spill]] %s2787_s30  ;;  %p1648_p12 = por %p198_p10, %p197_p9 }
  0x26   : > { %s182_s12 = ssub.s32 %s1524_s26, %s2787_s30  ;;  %p1128_p0 = scmp.ge.s32.totalorder %s1528_s27, 1 }
  0x27   : > { %s2722_s11 = scalar_select %p1648_p12, 1, 0 }
  0x28   : > { %p185_p1 = scmp.eq.s32.totalorder %s182_s12, 0  ;;  %p1657_p2 = por %p204_p13, %p203_p11 }
  0x29   : > { %p267_p3 = scmp.lt.s32.totalorder %s1528_s27, 3  ;;  %p2708_p5 = scmp.eq.s32.totalorder %s1636_s28, 0 }
  0x2a   : > { %s2723_s13 = scalar_select %p1657_p2, 1, 0 }
  0x2b   : > { %s1663_s14 = scalar_select %p185_p1, %s1516_s24, %s187_s10  }
  0x2c   : > { %2724 = sst [smem:[#allocation23_spill]] %s2723_s13  ;;  %p1665_p4 = pnand %p1128_p0, %p267_p3 }
  0x2d   : > { %2725 = sst [smem:[#allocation24_spill]] %s1663_s14  ;;  %s1532_s16 = smov [#allocation8]  }
  0x2e   : > { %s2726_s15 = scalar_select %p1665_p4, 1, 0 }
  0x2f   : > { %p1188_p6 = pneg %p1665_p4  ;;  %s302_s17 = sshll.u32 %s1532_s16, 4  ;;  %s303_s17 = int_to_ptr.vmem [resolvable:$true] %s302_s17 }
  0x30   : > { %s1533_s19 = smov [#allocation5]   ;;  %s2728_s4 = sld [smem:[#allocation27_spill]] }
  0x31   : > { %p1674_p7 = pnand %p2708_p5, %p1188_p6  ;;  %s282_s20 = sshll.u32 %s1533_s19, 4  ;;  %s1678_s20 = int_to_ptr.vmem [resolvable:$true] %s282_s20 }
  0x33   : > { %p1688_p9 = pneg %p1674_p7 }
  0x36   : > { %s1296_s23 = scalar_lea.hbm %s2728_s4, 128 }
  0x37   : > { %p1297_p8 = scmp.ne.s32.totalorder %s2728_s4, %s1296_s23  ;;  %p1303_p13 = scmp.lt.u32.totalorder %s1296_s23, %s2728_s4 }
  0x39   : > { %p1299_p10 = pnand %p1688_p9, %p1297_p8 }
  0x3b   : > { %p1300_p11 = pneg %p1299_p10 }
  0x3d   : > { %p1305_p0 = pnand %p1303_p13, %p1300_p11 }
  0x3f   : > { %1308 = shalt.err (!%p1305_p0)
}
  0x40   : > { %s1309_s21 = scalar_lea.vmem %s303_s17, 128  ;;  %p1317_p5 = scmp.lt.s32.totalorder %s303_s17, %s303_s17 }
  0x41   : > { %p1310_p1 = scmp.ne.s32.totalorder %s303_s17, %s1309_s21  ;;  %p1318_p2 = scmp.lt.s32.totalorder %s1309_s21, %s1309_s21 }
  0x43   : > { %p1312_p3 = pnand %p1310_p1, %p1688_p9  ;;  %p1319_p12 = por %p1318_p2, %p1317_p5 }
  0x45   : > { %p1313_p6 = pneg %p1312_p3 }
  0x47   : > { %p1320_p4 = pnand %p1319_p12, %p1313_p6 }
  0x49   : > { %1323 = shalt.err (!%p1320_p4)
}
  0x4a   : > { %1194 = dma.hbm_to_vmem [thread:$0]  (!%p1674_p7), %s2728_s4, 128, %s303_s17, [#allocation9]  }
  0x4b   : > { %s2730_s2 = sld [smem:[#allocation25_spill]] }
  0x51   : > { %s1324_s12 = scalar_lea.hbm %s2730_s2, 128 }
  0x52   : > { %p1325_p8 = scmp.ne.s32.totalorder %s2730_s2, %s1324_s12  ;;  %p1331_p12 = scmp.lt.u32.totalorder %s1324_s12, %s2730_s2 }
  0x54   : > { %p1327_p10 = pnand %p1325_p8, %p1688_p9 }
  0x56   : > { %p1328_p2 = pneg %p1327_p10 }
  0x58   : > { %p1333_p4 = pnand %p1331_p12, %p1328_p2 }
  0x5a   : > { %1336 = shalt.err (!%p1333_p4)
}
  0x5b   : > { %s1337_s17 = scalar_lea.vmem %s1678_s20, 128  ;;  %p1345_p0 = scmp.lt.s32.totalorder %s1678_s20, %s1678_s20 }
  0x5c   : > { %p1338_p5 = scmp.ne.s32.totalorder %s1678_s20, %s1337_s17  ;;  %p1346_p1 = scmp.lt.s32.totalorder %s1337_s17, %s1337_s17 }
  0x5e   : > { %p1340_p11 = pnand %p1338_p5, %p1688_p9  ;;  %p1347_p3 = por %p1346_p1, %p1345_p0 }
  0x60   : > { %p1341_p13 = pneg %p1340_p11 }
  0x62   : > { %p1348_p6 = pnand %p1347_p3, %p1341_p13 }
  0x64   : > { %1351 = shalt.err (!%p1348_p6)
}
  0x65   : > { %1191 = dma.hbm_to_vmem [thread:$0]  (!%p1674_p7), %s2730_s2, 128, %s1678_s20, [#allocation6]  }
  0x66   : > { %s1534_s22 = smov [#allocation10]   ;;  %s2731_s6 = sld [smem:[#allocation28_spill]] }
  0x67   : > { %s322_s10 = sshll.u32 %s1534_s22, 4  ;;  %s323_s10 = int_to_ptr.vmem [resolvable:$true] %s322_s10 }
  0x6c   : > { %s1352_s12 = scalar_lea.hbm %s2731_s6, 128 }
  0x6d   : > { %p1353_p8 = scmp.ne.s32.totalorder %s2731_s6, %s1352_s12  ;;  %p1359_p12 = scmp.lt.u32.totalorder %s1352_s12, %s2731_s6 }
  0x6f   : > { %p1355_p10 = pnand %p1353_p8, %p1688_p9 }
  0x71   : > { %p1356_p2 = pneg %p1355_p10 }
  0x73   : > { %p1361_p4 = pnand %p1359_p12, %p1356_p2 }
  0x75   : > { %1364 = shalt.err (!%p1361_p4)
}
  0x76   : > { %s1365_s20 = scalar_lea.vmem %s323_s10, 128  ;;  %p1373_p0 = scmp.lt.s32.totalorder %s323_s10, %s323_s10 }
  0x77   : > { %p1366_p5 = scmp.ne.s32.totalorder %s323_s10, %s1365_s20  ;;  %p1374_p1 = scmp.lt.s32.totalorder %s1365_s20, %s1365_s20 }
  0x79   : > { %p1368_p11 = pnand %p1366_p5, %p1688_p9  ;;  %p1375_p3 = por %p1374_p1, %p1373_p0 }
  0x7b   : > { %p1369_p13 = pneg %p1368_p11 }
  0x7d   : > { %p1376_p6 = pnand %p1375_p3, %p1369_p13 }
  0x7f   : > { %1379 = shalt.err (!%p1376_p6)
}
  0x80   : > { %1197 = dma.hbm_to_vmem [thread:$0]  (!%p1674_p7), %s2731_s6, 128, %s323_s10, [#allocation9]  }
  0x81   : > { %p2732_p8 = scmp.ne.s32.totalorder %s2726_s15, 0 }
  0x82   : > { %p2733_p10 = scmp.eq.s32.totalorder (!%p2732_p8), %s1636_s28, 0 }
  0x83   : > { %335 = sbr.rel (%p2732_p8) target bundleno = 307 (0x133), region = 40 }
  0x8a   : > { %1491 = dma.done.wait (%p2733_p10), [#allocation6], 128   ;;  %p2734_p9 = pmov %p2733_p10 }
  0x8c   : > { %1493 = vsyncadd (%p2734_p9), [#allocation6], 4294967168  ;;  %p2735_p2 = pmov %p2734_p9 }
  0x8e   : > { %1495 = dma.done.wait (%p2735_p2), [#allocation9], 256   ;;  %p2736_p12 = pmov %p2735_p2 }
  0x8f   : > { %s1756_s4 = sshll.u32 %s1520_s25, 9  ;;  %v1783_v0 = vld [vmem:[#allocation5] sm:$0xff]  ;;  %s2737_s3 = sld [smem:[#allocation26_spill]]  ;;  %v1849_v19 = vld [vmem:[#allocation8] sm:$0xff]  ;;  %v1902_v41 = vld [vmem:[#allocation10] sm:$0xff] }
  0x90   : > { %1497 = vsyncadd (%p2736_p12), [#allocation9], 4294967040  ;;  %s1759_s15 = sld [smem:[#allocation3 + %s1756_s4]]  ;;  %s1762_s18 = sadd.s32 128, %s1756_s4  ;;  %v1854_v20 = vld [vmem:[%s2701_s5] sm:$0xff] }
  0x91   : > { %s1765_s16 = sld [smem:[#allocation3 + %s1762_s18]]  ;;  %s1768_s22 = sadd.s32 256, %s1756_s4 }
  0x92   : > { %s1771_s10 = sld [smem:[#allocation3 + %s1768_s22]]  ;;  %s1774_s29 = sadd.s32 384, %s1756_s4 }
  0x93   : > { %s1777_s23 = sld [smem:[#allocation3 + %s1774_s29]]  ;;  %s460_s12 = sadd.s32 1, %s1756_s4 }
  0x94   : > { %s1780_s19 = sld [smem:[#allocation3 + %s460_s12]]  ;;  %s462_s21 = sadd.s32 1, %s1762_s18 }
  0x95   : > { %v1788_v1 = vld [vmem:[%s2737_s3] sm:$0xff]  ;;  %s1791_s26 = sld [smem:[#allocation3 + %s462_s21]]  ;;  %s464_s30 = sadd.s32 1, %s1768_s22 }
  0x96   : > { %v422_v2 = vstv %s1759_s15  ;;  %s1797_s12 = sld [smem:[#allocation3 + %s464_s30]]  ;;  %s466_s2 = sadd.s32 1, %s1774_s29 }
  0x97   : > { %v1795_v3 = vsub.f32 %v1783_v0, %v422_v2  ;;  %v424_v4 = vstv %s1765_s16  ;;  %s1801_s6 = sld [smem:[#allocation3 + %s466_s2]]  ;;  %s515_s17 = sadd.s32 2, %s1756_s4 }
  0x98   : > { %s415_s20 = ssub.f32 %s1771_s10, %s1759_s15  ;;  %v1807_v5 = vsub.f32 %v1788_v1, %v424_v4  ;;  %v426_v6 = vstv %s1771_s10  ;;  %s1810_s21 = sld [smem:[#allocation3 + %s515_s17]] }
  0x99   : > { %s416_s3 = ssub.f32 %s1777_s23, %s1765_s16  ;;  %v1815_v7 = vsub.f32 %v426_v6, %v1783_v0  ;;  %v428_v8 = vstv %s1777_s23  ;;  %s517_s2 = sadd.s32 2, %s1762_s18 }
  0x9a   : > { %s418_s30 = sadd.f32 %s1771_s10, %s1759_s15  ;;  %v1822_v9 = vsub.f32 %v428_v8, %v1788_v1  ;;  %v430_v10 = vmin.f32 %v1795_v3, %v1807_v5  ;;  %v433_v11 = vmax.f32 %v1795_v3, %v1807_v5  ;;  %v477_v12 = vstv %s1780_s19  ;;  %s1829_s17 = sld [smem:[#allocation3 + %s517_s2]] }
  0x9b   : > { %s1831_s14 = smul.f32 %s416_s3, %s415_s20  ;;  %s420_s24 = sadd.f32 %s1777_s23, %s1765_s16  ;;  %v1836_v13 = vsub.f32 %v1783_v0, %v477_v12  ;;  %v479_v14 = vstv %s1791_s26 }
  0x9c   : > { %s419_s15 = smul.f32 0.5, %s418_s30  ;;  %v431_v15 = vmin.f32 %v1815_v7, %v1822_v9  ;;  %v434_v16 = vmax.f32 %v1815_v7, %v1822_v9  ;;  %s470_s10 = ssub.f32 %s1797_s12, %s1780_s19  ;;  %v1846_v17 = vsub.f32 %v1788_v1, %v479_v14  ;;  %v481_v18 = vstv %s1797_s12 }
  0x9d   : > { %s421_s23 = smul.f32 0.5, %s420_s24  ;;  %s471_s20 = ssub.f32 %s1801_s6, %s1791_s26  ;;  %v1859_v21 = vsub.f32 %v481_v18, %v1783_v0  ;;  %v483_v22 = vstv %s1801_s6  ;;  %v450_v26 = vstv %s1831_s14 }
  0x9e   : > { %v432_v23 = vmin.f32 %v430_v10, %v431_v15  ;;  %v435_v24 = vmax.f32 %v433_v11, %v434_v16  ;;  %v436_v25 = vstv %s419_s15  ;;  %s473_s2 = sadd.f32 %s1797_s12, %s1780_s19  ;;  %s519_s30 = sadd.s32 2, %s1768_s22  ;;  %v1872_v29 = vsub.f32 %v483_v22, %v1788_v1 }
  0x9f   : > { %v437_v27 = vsub.f32 %v1783_v0, %v436_v25  ;;  %v439_v28 = vstv %s421_s23  ;;  %s1867_s13 = smul.f32 %s471_s20, %s470_s10  ;;  %s475_s3 = sadd.f32 %s1801_s6, %s1791_s26  ;;  %v485_v30 = vmin.f32 %v1836_v13, %v1846_v17  ;;  %v488_v35 = vmax.f32 %v1836_v13, %v1846_v17 }
  0xa0   : > { %v440_v31 = vsub.f32 %v1788_v1, %v439_v28  ;;  %vm443_vm0 = vcmp.gt.f32.partialorder %v432_v23, 0.0  ;;  %vm444_vm1 = vcmp.gt.f32.partialorder %v435_v24, %v1849_v19  ;;  %vm446_vm2 = vcmp.le.f32.partialorder %v435_v24, %v1854_v20  ;;  %s474_s24 = smul.f32 0.5, %s473_s2  ;;  %s1879_s19 = sld [smem:[#allocation3 + %s519_s30]] }
  0xa1   : > { %v438_v32 = vand.u32 2147483647, %v437_v27  ;;  %vm1881_vm3 = vmand %vm443_vm0, %vm444_vm1  ;;  %s476_s6 = smul.f32 0.5, %s475_s3  ;;  %v486_v34 = vmin.f32 %v1859_v21, %v1872_v29  ;;  %v489_v36 = vmax.f32 %v1859_v21, %v1872_v29  ;;  %s521_s26 = sadd.s32 2, %s1774_s29  ;;  %vm1894_vm4 = vcmp.lt.f32.partialorder %v450_v26, 1e+08 }
  0xa2   : > { %v441_v37 = vand.u32 2147483647, %v440_v31  ;;  %v491_v39 = vstv %s474_s24  ;;  %s1898_s12 = sld [smem:[#allocation3 + %s521_s26]]  ;;  %v532_v40 = vstv %s1810_s21  ;;  %s570_s15 = sadd.s32 3, %s1756_s4  ;;  %vm1912_vm5 = vmand %vm1881_vm3, %vm446_vm2  ;;  %v534_v50 = vstv %s1829_s17 }
  0xa3   : > { %v487_v42 = vmin.f32 %v485_v30, %v486_v34  ;;  %v490_v43 = vmax.f32 %v488_v35, %v489_v36  ;;  %v492_v44 = vsub.f32 %v1783_v0, %v491_v39  ;;  %v494_v45 = vstv %s476_s6  ;;  %s1905_s10 = sld [smem:[#allocation3 + %s570_s15]]  ;;  %s572_s16 = sadd.s32 3, %s1762_s18 }
  0xa4   : > { %v442_v46 = vmax.f32.f32 %v438_v32, %v441_v37  ;;  %v495_v48 = vsub.f32 %v1788_v1, %v494_v45  ;;  %v1918_v49 = vsub.f32 %v1783_v0, %v532_v40  ;;  %s1921_s23 = sld [smem:[#allocation3 + %s572_s16]]  ;;  %s574_s20 = sadd.s32 3, %s1768_s22  ;;  %v1937_v54 = vsub.f32 %v1788_v1, %v534_v50 }
  0xa5   : > { %v493_v51 = vand.u32 2147483647, %v492_v44  ;;  %vm498_vm6 = vcmp.gt.f32.partialorder %v487_v42, 0.0  ;;  %vm499_vm7 = vcmp.gt.f32.partialorder %v490_v43, %v1849_v19  ;;  %vm501_vm8 = vcmp.le.f32.partialorder %v490_v43, %v1854_v20  ;;  %s1926_s2 = sld [smem:[#allocation3 + %s574_s20]]  ;;  %s576_s30 = sadd.s32 3, %s1774_s29 }
  0xa6   : > { %vm448_vm9 = vcmp.lt.f32.partialorder %v442_v46, %v1902_v41  ;;  %v496_v52 = vand.u32 2147483647, %v495_v48  ;;  %vm1930_vm10 = vmand %vm498_vm6, %vm499_vm7  ;;  %s525_s3 = ssub.f32 %s1879_s19, %s1810_s21  ;;  %v536_v55 = vstv %s1879_s19  ;;  %s1940_s24 = sld [smem:[#allocation3 + %s576_s30]]  ;;  %v505_v56 = vstv %s1867_s13 }
  0xa7   : > { %vm449_vm11 = vmand %vm1912_vm5, %vm448_vm9  ;;  %s528_s6 = sadd.f32 %s1879_s19, %s1810_s21  ;;  %s625_s26 = sadd.s32 4, %s1756_s4  ;;  %v1957_v59 = vsub.f32 %v536_v55, %v1783_v0  ;;  %v540_v62 = vmin.f32 %v1918_v49, %v1937_v54  ;;  %v543_v2 = vmax.f32 %v1918_v49, %v1937_v54 }
  0xa8   : > { %vm1950_vm12 = vmand %vm449_vm11, %vm1894_vm4  ;;  %v497_v58 = vmax.f32.f32 %v493_v51, %v496_v52  ;;  %s526_s15 = ssub.f32 %s1898_s12, %s1829_s17  ;;  %v538_v60 = vstv %s1898_s12  ;;  %s1960_s16 = sld [smem:[#allocation3 + %s625_s26]] }
  0xa9   : > { %v453_v61 = vsel %vm1950_vm12, %v450_v26, 1e+08  ;;  %vm502_vm13 = vmand %vm1930_vm10, %vm501_vm8  ;;  %s529_s13 = smul.f32 0.5, %s528_s6  ;;  %s530_s21 = sadd.f32 %s1898_s12, %s1829_s17  ;;  %v1978_v63 = vsub.f32 %v538_v60, %v1788_v1  ;;  %v587_v6 = vstv %s1905_s10  ;;  %v454_v15 = vsel %vm1950_vm12, %v1795_v3, 0.0 }
  0xaa   : > { %vm503_vm14 = vcmp.lt.f32.partialorder %v497_v58, %v1902_v41  ;;  %vm506_vm15 = vcmp.lt.f32.partialorder %v505_v56, %v453_v61  ;;  %s1975_s14 = smul.f32 %s526_s15, %s525_s3  ;;  %s627_s19 = sadd.s32 4, %s1762_s18  ;;  %v589_v14 = vstv %s1921_s23  ;;  %v455_v16 = vsel %vm1950_vm12, %v1807_v5, 0.0 }
  0xab   : > { %vm504_vm0 = vmand %vm502_vm13, %vm503_vm14  ;;  %s531_s17 = smul.f32 0.5, %s530_s21  ;;  %v546_v4 = vstv %s529_s13  ;;  %s580_s12 = ssub.f32 %s1926_s2, %s1905_s10  ;;  %v541_v10 = vmin.f32 %v1957_v59, %v1978_v63  ;;  %v544_v11 = vmax.f32 %v1957_v59, %v1978_v63  ;;  %v456_v18 = vsel %vm1950_vm12, %v1815_v7, 0.0 }
  0xac   : > { %vm1986_vm1 = vmand %vm504_vm0, %vm506_vm15  ;;  %v547_v12 = vsub.f32 %v1783_v0, %v546_v4  ;;  %s581_s20 = ssub.f32 %s1940_s24, %s1921_s23  ;;  %s1998_s30 = sld [smem:[#allocation3 + %s627_s19]]  ;;  %v591_v22 = vstv %s1926_s2  ;;  %v560_v26 = vstv %s1975_s14  ;;  %v2023_v30 = vsub.f32 %v1783_v0, %v587_v6 }
  0xad   : > { %s583_s3 = sadd.f32 %s1926_s2, %s1905_s10  ;;  %s629_s6 = sadd.s32 4, %s1768_s22  ;;  %v2015_v23 = vsel %vm1986_vm1, %v505_v56, %v453_v61  ;;  %v542_v24 = vmin.f32 %v540_v62, %v541_v10  ;;  %v545_v25 = vmax.f32 %v543_v2, %v544_v11  ;;  %v549_v28 = vstv %s531_s17 }
  0xae   : > { %s2018_s26 = smul.f32 %s581_s20, %s580_s12  ;;  %s585_s15 = sadd.f32 %s1940_s24, %s1921_s23  ;;  %v548_v27 = vand.u32 2147483647, %v547_v12  ;;  %v2026_v31 = vsub.f32 %v1788_v1, %v589_v14  ;;  %v550_v32 = vsub.f32 %v1788_v1, %v549_v28  ;;  %v2039_v34 = vsub.f32 %v591_v22, %v1783_v0 }
  0xaf   : > { %s584_s13 = smul.f32 0.5, %s583_s3  ;;  %s2028_s10 = sld [smem:[#allocation3 + %s629_s6]]  ;;  %vm553_vm2 = vcmp.gt.f32.partialorder %v542_v24, 0.0  ;;  %vm554_vm3 = vcmp.gt.f32.partialorder %v545_v25, %v1849_v19  ;;  %vm556_vm4 = vcmp.le.f32.partialorder %v545_v25, %v1854_v20  ;;  %v593_v35 = vstv %s1940_s24 }
  0xb0   : > { %s586_s23 = smul.f32 0.5, %s585_s15  ;;  %s631_s2 = sadd.s32 4, %s1774_s29  ;;  %vm2034_vm5 = vmand %vm553_vm2, %vm554_vm3  ;;  %v595_v36 = vmin.f32 %v2023_v30, %v2026_v31  ;;  %v598_v37 = vmax.f32 %v2023_v30, %v2026_v31  ;;  %v551_v38 = vand.u32 2147483647, %v550_v32  ;;  %v2050_v39 = vsub.f32 %v593_v35, %v1788_v1 }
  0xb1   : > { %s2046_s21 = sld [smem:[#allocation3 + %s631_s2]]  ;;  %s680_s19 = sadd.s32 5, %s1756_s4  ;;  %v601_v40 = vstv %s584_s13  ;;  %vm2058_vm6 = vcmp.lt.f32.partialorder %v560_v26, %v2015_v23  ;;  %v642_v46 = vstv %s1960_s16  ;;  %vm2072_vm7 = vmand %vm2034_vm5, %vm556_vm4  ;;  %v615_v4 = vstv %s2018_s26 }
  0xb2   : > { %v604_v42 = vstv %s586_s23  ;;  %s2052_s17 = sld [smem:[#allocation3 + %s680_s19]]  ;;  %s682_s24 = sadd.s32 5, %s1762_s18  ;;  %v602_v44 = vsub.f32 %v1783_v0, %v601_v40  ;;  %v552_v47 = vmax.f32.f32 %v548_v27, %v551_v38  ;;  %v596_v50 = vmin.f32 %v2039_v34, %v2050_v39 }
  0xb3   : > { %v605_v45 = vsub.f32 %v1788_v1, %v604_v42  ;;  %s2065_s12 = sld [smem:[#allocation3 + %s682_s24]]  ;;  %s684_s20 = sadd.s32 5, %s1768_s22  ;;  %v599_v51 = vmax.f32 %v2039_v34, %v2050_v39  ;;  %v2081_v52 = vsub.f32 %v1783_v0, %v642_v46  ;;  %v644_v56 = vstv %s1998_s30 }
  0xb4   : > { %s2083_s3 = sld [smem:[#allocation3 + %s684_s20]]  ;;  %s686_s6 = sadd.s32 5, %s1774_s29  ;;  %v603_v53 = vand.u32 2147483647, %v602_v44  ;;  %vm558_vm8 = vcmp.lt.f32.partialorder %v552_v47, %v1902_v41  ;;  %v597_v60 = vmin.f32 %v595_v36, %v596_v50  ;;  %v2096_v62 = vsub.f32 %v1788_v1, %v644_v56 }
  0xb5   : > { %v606_v55 = vand.u32 2147483647, %v605_v45  ;;  %s635_s15 = ssub.f32 %s2028_s10, %s1960_s16  ;;  %v646_v58 = vstv %s2028_s10  ;;  %s2090_s13 = sld [smem:[#allocation3 + %s686_s6]]  ;;  %v600_v61 = vmax.f32 %v598_v37, %v599_v51  ;;  %vm559_vm9 = vmand %vm2072_vm7, %vm558_vm8  ;;  %v457_v14 = vsel %vm1950_vm12, %v1822_v9, 0.0 }
  0xb6   : > { %s638_s23 = sadd.f32 %s2028_s10, %s1960_s16  ;;  %s735_s2 = sadd.s32 6, %s1756_s4  ;;  %v2105_v6 = vsub.f32 %v646_v58, %v1783_v0  ;;  %vm2112_vm10 = vmand %vm559_vm9, %vm2058_vm6  ;;  %vm608_vm11 = vcmp.gt.f32.partialorder %v597_v60, 0.0  ;;  %v2133_v22 = vsel %vm1986_vm1, %v1836_v13, %v454_v15  ;;  %v2142_v24 = vsel %vm1986_vm1, %v1846_v17, %v455_v16 }
  0xb7   : > { %v607_v2 = vmax.f32.f32 %v603_v53, %v606_v55  ;;  %s636_s19 = ssub.f32 %s2046_s21, %s1998_s30  ;;  %v648_v10 = vstv %s2046_s21  ;;  %s2108_s24 = sld [smem:[#allocation3 + %s735_s2]]  ;;  %vm609_vm13 = vcmp.gt.f32.partialorder %v600_v61, %v1849_v19  ;;  %vm611_vm14 = vcmp.le.f32.partialorder %v600_v61, %v1854_v20 }
  0xb8   : > { %s639_s26 = smul.f32 0.5, %s638_s23  ;;  %s640_s20 = sadd.f32 %s2046_s21, %s1998_s30  ;;  %v2121_v12 = vsub.f32 %v648_v10, %v1788_v1  ;;  %v563_v9 = vsel %vm2112_vm10, %v560_v26, %v2015_v23  ;;  %vm610_vm15 = vmand %vm608_vm11, %vm609_vm13  ;;  %v2162_v3 = vsel %vm1986_vm1, %v1859_v21, %v456_v18  ;;  %v650_v5 = vmin.f32 %v2081_v52, %v2096_v62 }
  0xb9   : > { %s2152_s30 = smul.f32 %s636_s19, %s635_s15  ;;  %s737_s21 = sadd.s32 6, %s1762_s18  ;;  %vm612_vm0 = vmand %vm610_vm15, %vm611_vm14  ;;  %vm613_vm2 = vcmp.lt.f32.partialorder %v607_v2, %v1902_v41  ;;  %vm616_vm3 = vcmp.lt.f32.partialorder %v615_v4, %v563_v9  ;;  %v653_v13 = vmax.f32 %v2081_v52, %v2096_v62  ;;  %v697_v23 = vstv %s2052_s17 }
  0xba   : > { %s641_s16 = smul.f32 0.5, %s640_s20  ;;  %s690_s14 = ssub.f32 %s2083_s3, %s2052_s17  ;;  %vm614_vm4 = vmand %vm612_vm0, %vm613_vm2  ;;  %v651_v7 = vmin.f32 %v2105_v6, %v2121_v12  ;;  %v654_v17 = vmax.f32 %v2105_v6, %v2121_v12  ;;  %v656_v21 = vstv %s639_s26  ;;  %v2191_v25 = vsel %vm1986_vm1, %v1872_v29, %v457_v14 }
  0xbb   : > { %s691_s10 = ssub.f32 %s2090_s13, %s2065_s12  ;;  %s2177_s6 = sld [smem:[#allocation3 + %s737_s21]]  ;;  %vm2179_vm5 = vmand %vm614_vm4, %vm616_vm3  ;;  %v657_v16 = vsub.f32 %v1783_v0, %v656_v21  ;;  %v564_v26 = vsel %vm2112_vm10, %v1918_v49, %v2133_v22  ;;  %v565_v27 = vsel %vm2112_vm10, %v1937_v54, %v2142_v24  ;;  %v566_v28 = vsel %vm2112_vm10, %v1957_v59, %v2162_v3 }
  0xbc   : > { %v659_v18 = vstv %s641_s16  ;;  %s693_s15 = sadd.f32 %s2083_s3, %s2052_s17  ;;  %s739_s23 = sadd.s32 6, %s1768_s22  ;;  %v2211_v29 = vsel %vm2179_vm5, %v615_v4, %v563_v9  ;;  %v652_v32 = vmin.f32 %v650_v5, %v651_v7  ;;  %v655_v33 = vmax.f32 %v653_v13, %v654_v17 }
  0xbd   : > { %s2205_s17 = smul.f32 %s691_s10, %s690_s14  ;;  %s695_s2 = sadd.f32 %s2090_s13, %s2065_s12  ;;  %v670_v35 = vstv %s2152_s30  ;;  %v658_v36 = vand.u32 2147483647, %v657_v16  ;;  %v660_v37 = vsub.f32 %v1788_v1, %v659_v18  ;;  %v2220_v38 = vsub.f32 %v1783_v0, %v697_v23 }
  0xbe   : > { %s694_s19 = smul.f32 0.5, %s693_s15  ;;  %s2214_s26 = sld [smem:[#allocation3 + %s739_s23]]  ;;  %v699_v40 = vstv %s2065_s12  ;;  %vm663_vm6 = vcmp.gt.f32.partialorder %v652_v32, 0.0  ;;  %vm664_vm7 = vcmp.gt.f32.partialorder %v655_v33, %v1849_v19  ;;  %vm666_vm8 = vcmp.le.f32.partialorder %v655_v33, %v1854_v20 }
  0xbf   : > { %s2217_s20 = smul.f32 0.5, %s695_s2  ;;  %s741_s21 = sadd.s32 6, %s1774_s29  ;;  %v2227_v42 = vsub.f32 %v1788_v1, %v699_v40  ;;  %v661_v43 = vand.u32 2147483647, %v660_v37  ;;  %vm665_vm9 = vmand %vm663_vm6, %vm664_vm7  ;;  %v701_v44 = vstv %s2083_s3  ;;  %v703_v45 = vstv %s2090_s13 }
  0xc0   : > { %s2229_s16 = sld [smem:[#allocation3 + %s741_s21]]  ;;  %s790_s14 = sadd.s32 7, %s1756_s4  ;;  %v711_v46 = vstv %s694_s19  ;;  %v2238_v47 = vsub.f32 %v701_v44, %v1783_v0  ;;  %v2241_v48 = vsub.f32 %v703_v45, %v1788_v1  ;;  %vm2252_vm11 = vmand %vm665_vm9, %vm666_vm8  ;;  %vm2259_vm13 = vcmp.lt.f32.partialorder %v670_v35, %v2211_v29 }
  0xc1   : > { %s2234_s12 = sld [smem:[#allocation3 + %s790_s14]]  ;;  %s792_s10 = sadd.s32 7, %s1762_s18  ;;  %v705_v50 = vmin.f32 %v2220_v38, %v2227_v42  ;;  %v708_v51 = vmax.f32 %v2220_v38, %v2227_v42  ;;  %v662_v53 = vmax.f32.f32 %v658_v36, %v661_v43  ;;  %v712_v58 = vsub.f32 %v1783_v0, %v711_v46 }
  0xc2   : > { %s2247_s3 = sld [smem:[#allocation3 + %s792_s10]]  ;;  %s794_s13 = sadd.s32 7, %s1768_s22  ;;  %v714_v60 = vstv %s2217_s20  ;;  %v706_v61 = vmin.f32 %v2238_v47, %v2241_v48  ;;  %v709_v2 = vmax.f32 %v2238_v47, %v2241_v48  ;;  %v752_v10 = vstv %s2108_s24 }
  0xc3   : > { %s2265_s18 = sld [smem:[#allocation3 + %s794_s13]]  ;;  %s796_s22 = sadd.s32 7, %s1774_s29  ;;  %v715_v4 = vsub.f32 %v1788_v1, %v714_v60  ;;  %v567_v14 = vsel %vm2112_vm10, %v1978_v63, %v2191_v25  ;;  %vm668_vm14 = vcmp.lt.f32.partialorder %v662_v53, %v1902_v41  ;;  %v713_v9 = vand.u32 2147483647, %v712_v58 }
  0xc4   : > { %s745_s15 = ssub.f32 %s2214_s26, %s2108_s24  ;;  %s2276_s23 = sld [smem:[#allocation3 + %s796_s22]]  ;;  %v754_v5 = vstv %s2177_s6  ;;  %vm669_vm15 = vmand %vm2252_vm11, %vm668_vm14  ;;  %v707_v7 = vmin.f32 %v705_v50, %v706_v61  ;;  %v710_v13 = vmax.f32 %v708_v51, %v709_v2  ;;  %v725_v21 = vstv %s2205_s17 }
  0xc5   : > { %s748_s29 = sadd.f32 %s2214_s26, %s2108_s24  ;;  %v716_v17 = vand.u32 2147483647, %v715_v4  ;;  %vm2293_vm0 = vmand %vm669_vm15, %vm2259_vm13  ;;  %v2302_v16 = vsub.f32 %v1783_v0, %v752_v10  ;;  %v2305_v18 = vsub.f32 %v1788_v1, %v754_v5  ;;  %v756_v23 = vstv %s2214_s26  ;;  %s2364_s20 = sshll.u32 %s1520_s25, 7 }
  0xc6   : > { %s746_s2 = ssub.f32 %s2229_s16, %s2177_s6  ;;  %v758_v25 = vstv %s2229_s16  ;;  %v2317_v32 = vsel %vm2179_vm5, %v2023_v30, %v564_v26  ;;  %v2327_v33 = vsel %vm2179_vm5, %v2026_v31, %v565_v27  ;;  %v2337_v49 = vsel %vm2179_vm5, %v2039_v34, %v566_v28  ;;  %s468_s10 = sadd.s32 1, %s2364_s20 }
  0xc7   : > { %s2297_s19 = smul.f32 0.5, %s748_s29  ;;  %s750_s24 = sadd.f32 %s2229_s16, %s2177_s6  ;;  %v673_v54 = vsel %vm2293_vm0, %v670_v35, %v2211_v29  ;;  %v717_v30 = vmax.f32.f32 %v713_v9, %v716_v17  ;;  %vm718_vm2 = vcmp.gt.f32.partialorder %v707_v7, 0.0  ;;  %vm719_vm3 = vcmp.gt.f32.partialorder %v710_v13, %v1849_v19 }
  0xc8   : > { %s2344_s6 = smul.f32 %s746_s2, %s745_s15  ;;  %v807_v59 = vstv %s2234_s12  ;;  %vm720_vm4 = vmand %vm718_vm2, %vm719_vm3  ;;  %vm721_vm6 = vcmp.le.f32.partialorder %v710_v13, %v1854_v20  ;;  %vm2351_vm7 = vcmp.lt.f32.partialorder %v725_v21, %v673_v54  ;;  %v2356_v34 = vsub.f32 %v756_v23, %v1783_v0  ;;  %s2375_s16 = sld [smem:[#allocation4 + %s2364_s20]] }
  0xc9   : > { %s751_s17 = smul.f32 0.5, %s750_s24  ;;  %s800_s26 = ssub.f32 %s2265_s18, %s2234_s12  ;;  %v2359_v22 = vsub.f32 %v758_v25, %v1788_v1  ;;  %vm722_vm8 = vmand %vm720_vm4, %vm721_vm6  ;;  %vm723_vm9 = vcmp.lt.f32.partialorder %v717_v30, %v1902_v41  ;;  %v760_v24 = vmin.f32 %v2302_v16, %v2305_v18  ;;  %v763_v3 = vmax.f32 %v2302_v16, %v2305_v18 }
  0xca   : > { %s801_s30 = ssub.f32 %s2276_s23, %s2247_s3  ;;  %v766_v26 = vstv %s2297_s19  ;;  %vm724_vm11 = vmand %vm722_vm8, %vm723_vm9  ;;  %v2389_v36 = vsel %vm2179_vm5, %v2050_v39, %v567_v14  ;;  %v674_v37 = vsel %vm2293_vm0, %v2081_v52, %v2317_v32  ;;  %v809_v44 = vstv %s2247_s3  ;;  %s2420_s22 = sld [smem:[#allocation4 + %s468_s10]] }
  0xcb   : > { %s803_s21 = sadd.f32 %s2265_s18, %s2234_s12  ;;  %v761_v27 = vmin.f32 %v2356_v34, %v2359_v22  ;;  %v764_v28 = vmax.f32 %v2356_v34, %v2359_v22  ;;  %v767_v29 = vsub.f32 %v1783_v0, %v766_v26  ;;  %v769_v35 = vstv %s751_s17  ;;  %vm2397_vm13 = vmand %vm724_vm11, %vm2351_vm7  ;;  %s578_s15 = sadd.s32 3, %s2364_s20 }
  0xcc   : > { %s2382_s25 = smul.f32 %s801_s30, %s800_s26  ;;  %s805_s14 = sadd.f32 %s2276_s23, %s2247_s3  ;;  %v770_v43 = vsub.f32 %v1788_v1, %v769_v35  ;;  %v675_v39 = vsel %vm2293_vm0, %v2096_v62, %v2327_v33  ;;  %v676_v45 = vsel %vm2293_vm0, %v2105_v6, %v2337_v49  ;;  %v780_v46 = vstv %s2344_s6 }
  0xcd   : > { %s2402_s12 = smul.f32 0.5, %s803_s21  ;;  %v2418_v50 = vsub.f32 %v1783_v0, %v807_v59  ;;  %v728_v51 = vsel %vm2397_vm13, %v725_v21, %v673_v54  ;;  %v762_v53 = vmin.f32 %v760_v24, %v761_v27  ;;  %v765_v62 = vmax.f32 %v763_v3, %v764_v28  ;;  %s523_s3 = sadd.s32 2, %s2364_s20 }
  0xce   : > { %s2415_s13 = smul.f32 0.5, %s805_s14  ;;  %v768_v55 = vand.u32 2147483647, %v767_v29  ;;  %v677_v6 = vsel %vm2293_vm0, %v2121_v12, %v2389_v36  ;;  %v771_v56 = vand.u32 2147483647, %v770_v43  ;;  %v2431_v58 = vsub.f32 %v1788_v1, %v809_v44  ;;  %s2434_s29 = sld [smem:[#allocation4 + %s523_s3]] }
  0xcf   : > { %v811_v60 = vstv %s2265_s18  ;;  %s2436_s2 = sld [smem:[#allocation4 + %s578_s15]]  ;;  %vm773_vm14 = vcmp.gt.f32.partialorder %v762_v53, 0.0  ;;  %vm774_vm15 = vcmp.gt.f32.partialorder %v765_v62, %v1849_v19  ;;  %vm776_vm2 = vcmp.le.f32.partialorder %v765_v62, %v1854_v20  ;;  %s633_s19 = sadd.s32 4, %s2364_s20 }
  0xd0   : > { %v2441_v61 = vsub.f32 %v811_v60, %v1783_v0  ;;  %s688_s24 = sadd.s32 5, %s2364_s20  ;;  %v772_v12 = vmax.f32.f32 %v768_v55, %v771_v56  ;;  %vm775_vm3 = vmand %vm773_vm14, %vm774_vm15  ;;  %vm2445_vm4 = vcmp.lt.f32.partialorder %v780_v46, %v728_v51  ;;  %v813_v4 = vstv %s2276_s23  ;;  %s2452_s18 = sld [smem:[#allocation4 + %s633_s19]] }
  0xd1   : > { %v815_v10 = vmin.f32 %v2418_v50, %v2431_v58  ;;  %s2454_s6 = sld [smem:[#allocation4 + %s688_s24]]  ;;  %vm777_vm6 = vmand %vm775_vm3, %vm776_vm2  ;;  %v2457_v14 = vsub.f32 %v813_v4, %v1788_v1  ;;  %v818_v9 = vmax.f32 %v2418_v50, %v2431_v58  ;;  %v821_v5 = vstv %s2402_s12  ;;  %s743_s17 = sadd.s32 6, %s2364_s20 }
  0xd2   : > { %v824_v7 = vstv %s2415_s13  ;;  %s798_s26 = sadd.s32 7, %s2364_s20  ;;  %s2466_s23 = sand.u32 1, %s1512_s1   ;;  %vm778_vm7 = vcmp.lt.f32.partialorder %v772_v12, %v1902_v41  ;;  %v822_v13 = vsub.f32 %v1783_v0, %v821_v5  ;;  %v458_v21 = vstv %s2375_s16 }
  0xd3   : > { %v825_v17 = vsub.f32 %v1788_v1, %v824_v7  ;;  %s2472_s30 = sld [smem:[#allocation4 + %s743_s17]]  ;;  %vm779_vm8 = vmand %vm777_vm6, %vm778_vm7  ;;  %v816_v23 = vmin.f32 %v2441_v61, %v2457_v14  ;;  %v819_v25 = vmax.f32 %v2441_v61, %v2457_v14  ;;  %v459_v33 = vsel %vm1950_vm12, %v458_v21, 0  ;;  %s1138_s16 = sshll.u32 %s2466_s23, 3 }
  0xd4   : > { %v513_v49 = vstv %s2420_s22  ;;  %vm2483_vm9 = vmand %vm779_vm8, %vm2445_vm4  ;;  %v823_v1 = vand.u32 2147483647, %v822_v13  ;;  %v568_v59 = vstv %s2434_s29  ;;  %s2490_s21 = sld [smem:[#allocation4 + %s798_s26]]  ;;  %v729_v57 = vsel %vm2397_vm13, %v2220_v38, %v674_v37  ;;  %s373_s14 = scalar_lea.vmem [#allocation11], %s1138_s16 }
  0xd5   : > { %v826_v54 = vand.u32 2147483647, %v825_v17  ;;  %v514_v30 = vsel %vm1986_vm1, %v513_v49, %v459_v33  ;;  %v730_v31 = vsel %vm2397_vm13, %v2227_v42, %v675_v39  ;;  %v731_v8 = vsel %vm2397_vm13, %v2238_v47, %v676_v45  ;;  %s905_s12 = sshll.u32 %s373_s14, 4  ;;  %s2567_s22 = scalar_lea.hbm %s2703_s7, %s2364_s20  ;;  %s2559_s12 = int_to_ptr.vmem [resolvable:$true] %s905_s12 }
  0xd6   : > { %v835_v24 = vstv %s2382_s25  ;;  %v783_v3 = vsel %vm2483_vm9, %v780_v46, %v728_v51  ;;  %v817_v26 = vmin.f32 %v815_v10, %v816_v23  ;;  %v820_v52 = vmax.f32 %v818_v9, %v819_v25  ;;  %s1140_s25 = sshll.u32 %s2466_s23, 5  ;;  %s881_s15 = scalar_lea.sflag [#allocation7], %s2466_s23 }
  0xd7   : > { %v827_v32 = vmax.f32.f32 %v823_v1, %v826_v54  ;;  %v732_v38 = vsel %vm2397_vm13, %v2241_v48, %v677_v6  ;;  %v569_v42 = vsel %vm2112_vm10, %v568_v59, %v514_v30  ;;  %v623_v27 = vstv %s2436_s2  ;;  %s2571_s3 = scalar_lea.vmem [#allocation14], %s1140_s25  ;;  %s1380_s29 = scalar_lea.vmem %s2559_s12, 128 }
  0xd8   : > { %v678_v28 = vstv %s2452_s18  ;;  %vm828_vm12 = vcmp.gt.f32.partialorder %v817_v26, 0.0  ;;  %vm829_vm1 = vcmp.gt.f32.partialorder %v820_v52, %v1849_v19  ;;  %vm831_vm11 = vcmp.le.f32.partialorder %v820_v52, %v1854_v20  ;;  %p1381_p7 = scmp.ne.s32.totalorder %s2559_s12, %s1380_s29  ;;  %p2776_p4 = scmp.ne.s32.totalorder %s2722_s11, 0 }
  0xd9   : > { %vm833_vm14 = vcmp.lt.f32.partialorder %v827_v32, %v1902_v41  ;;  %vm830_vm15 = vmand %vm828_vm12, %vm829_vm1  ;;  %vm2520_vm2 = vcmp.lt.f32.partialorder %v835_v24, %v783_v3  ;;  %v624_v11 = vsel %vm2179_vm5, %v623_v27, %v569_v42  ;;  %v733_v48 = vstv %s2454_s6  ;;  %s1535_s2 = smov [#allocation11]  }
  0xda   : > { %v788_v29 = vstv %s2472_s30  ;;  %v784_v19 = vsel %vm2483_vm9, %v2302_v16, %v729_v57  ;;  %v785_v20 = vsel %vm2483_vm9, %v2305_v18, %v730_v31  ;;  %v786_v41 = vsel %vm2483_vm9, %v2356_v34, %v731_v8  ;;  %vm832_vm10 = vmand %vm830_vm15, %vm831_vm11  ;;  %p1382_p5 = pnand %p1381_p7, %p2776_p4  ;;  %s1384_s19 = sshll.u32 %s1535_s2, 4  ;;  %s1385_s19 = int_to_ptr.vmem [resolvable:$false] %s1384_s19 }
  0xdb   : > { %v679_v15 = vsel %vm2293_vm0, %v678_v28, %v624_v11  ;;  %v787_v35 = vsel %vm2483_vm9, %v2359_v22, %v732_v38  ;;  %vm834_vm5 = vmand %vm832_vm10, %vm833_vm14  ;;  %v843_v18 = vstv %s2490_s21  ;;  %s1386_s24 = scalar_lea.vmem %s1385_s19, 256  ;;  %p1387_p13 = scmp.lt.s32.totalorder %s2559_s12, %s1385_s19 }
  0xdc   : > { %v734_v16 = vsel %vm2397_vm13, %v733_v48, %v679_v15  ;;  %vm837_vm3 = vmand %vm834_vm5, %vm2520_vm2  ;;  %p1383_p11 = pneg %p1382_p5  ;;  %p1388_p0 = scmp.lt.s32.totalorder %s1386_s24, %s1380_s29 }
  0xdd   : > { %v789_v63 = vsel %vm2483_vm9, %v788_v29, %v734_v16  ;;  %v2552_v34 = vsel %vm837_vm3, %v835_v24, %v783_v3  ;;  %v839_v36 = vsel %vm837_vm3, %v2418_v50, %v784_v19  ;;  %v840_v22 = vsel %vm837_vm3, %v2431_v58, %v785_v20 }
  0xde   : > { %v841_v37 = vsel %vm837_vm3, %v2441_v61, %v786_v41  ;;  %v842_v40 = vsel %vm837_vm3, %v2457_v14, %v787_v35  ;;  %vm845_vm0 = vcmp.lt.f32.partialorder %v2552_v34, 1e+08  ;;  %v844_v39 = vsel %vm837_vm3, %v843_v18, %v789_v63  ;;  %p1389_p1 = por %p1388_p0, %p1387_p13 }
  0xdf   : > { %v847_v43 = vmax.f32 %v839_v36, %v841_v37  ;;  %v849_v44 = vmax.f32 %v840_v22, %v842_v40  ;;  %v866_v45 = vsel %vm845_vm0, %v839_v36, -1.0  ;;  %v862_v46 = vsel %vm845_vm0, %v844_v39, 0 }
  0xe0   : > { %867 = vst [vmem:[%s2571_s3] sm:$0xff] %v866_v45  ;;  %v868_v50 = vsel %vm845_vm0, %v840_v22, -1.0  ;;  %v872_v51 = vsel %vm845_vm0, %v841_v37, -1.0  ;;  %v876_v53 = vsel %vm845_vm0, %v842_v40, -1.0  ;;  %863 = vst [vmem:[%s373_s14] sm:$0xff] %v862_v46  ;;  %p1390_p3 = pnand %p1389_p1, %p1383_p11 }
  0xe1   : > { %v851_v62 = vmul.f32 %v849_v44, %v847_v43  ;;  %1147 = vst [vmem:[%s2571_s3 + $0x8] sm:$0xff] %v868_v50  ;;  %1148 = vst [vmem:[%s2571_s3 + $0x10] sm:$0xff] %v872_v51 }
  0xe2   : > { %1149 = vst [vmem:[%s2571_s3 + $0x18] sm:$0xff] %v876_v53 }
  0xe3   : > { %1393 = shalt.err (!%p1390_p3)
}
  0xe4   : > { %s1394_s18 = scalar_lea.hbm %s2567_s22, 128  ;;  %s1398_s26 = scalar_lea.hbm %s2703_s7, 256 }
  0xe5   : > { %p1395_p6 = scmp.ne.s32.totalorder %s2567_s22, %s1394_s18  ;;  %p1399_p9 = scmp.lt.u32.totalorder %s2567_s22, %s2703_s7 }
  0xe6   : > { %p1400_p2 = scmp.lt.u32.totalorder %s1398_s26, %s1394_s18  ;;  %p1402_p7 = scmp.lt.u32.totalorder %s1394_s18, %s2567_s22 }
  0xe7   : > { %p1396_p8 = pnand %p1395_p6, %p2776_p4 }
  0xe8   : > { %p1401_p12 = por %p1400_p2, %p1399_p9 }
  0xe9   : > { %p1397_p10 = pneg %p1396_p8 }
  0xea   : > { %p1403_p5 = por %p1402_p7, %p1401_p12 }
  0xec   : > { %p1404_p11 = pnand %p1403_p5, %p1397_p10 }
  0xee   : > { %1407 = shalt.err (!%p1404_p11)
}
  0xef   : > { %1182 = dma.vmem_to_hbm [thread:$0]  (%p2776_p4), %s2559_s12, 128, %s2567_s22, %s881_s15   ;;  %v852_v55 = vadd.f32 1e-10, %v851_v62  ;;  %v846_v6 = vmin.f32 %v839_v36, %v841_v37  ;;  %v848_v56 = vmin.f32 %v840_v22, %v842_v40 }
  0xf0   : > { %s380_s25 = scalar_lea.vmem [#allocation12], %s1138_s16  ;;  %s933_s10 = sshll.u32 %s2571_s3, 4  ;;  %s2611_s10 = int_to_ptr.vmem [resolvable:$true] %s933_s10 }
  0xf1   : > { %1270 = vrcp.f32 %v852_v55  ;;  %v850_v58 = vmul.f32 %v848_v56, %v846_v6  ;;  %s919_s14 = sshll.u32 %s380_s25, 4  ;;  %s885_s13 = sand.u32 1, %s1636_s28   ;;  %s2609_s14 = int_to_ptr.vmem [resolvable:$true] %s919_s14 }
  0xf2   : > { %s2617_s12 = scalar_lea.hbm %s2704_s8, %s2364_s20  ;;  %s2623_s28 = scalar_lea.hbm %s2705_s9, %s1756_s4 }
  0xf3   : > { %s2627_s3 = scalar_lea.sflag [#allocation13], %s885_s13  ;;  %s1408_s29 = scalar_lea.vmem %s2609_s14, 128 }
  0xf4   : > { %p1409_p13 = scmp.ne.s32.totalorder %s2609_s14, %s1408_s29  ;;  %s1536_s2 = smov [#allocation12]  }
  0xf5   : > { %s1412_s19 = sshll.u32 %s1536_s2, 4  ;;  %s1413_s19 = int_to_ptr.vmem [resolvable:$false] %s1412_s19 }
  0xf6   : > { %p1410_p0 = pnand %p1409_p13, %p2776_p4  ;;  %s1414_s20 = scalar_lea.vmem %s1413_s19, 256 }
  0xf7   : > { %p1415_p3 = scmp.lt.s32.totalorder %s2609_s14, %s1413_s19  ;;  %p1416_p6 = scmp.lt.s32.totalorder %s1414_s20, %s1408_s29 }
  0xf8   : > { %p1411_p1 = pneg %p1410_p0 }
  0xf9   : > { %p1417_p8 = por %p1416_p6, %p1415_p3 }
  0xfb   : > { %v1271_v60 = vpop.eup %1270  ;;  %p1418_p10 = pnand %p1417_p8, %p1411_p1 }
  0xfc   : > { %v854_v61 = vmul.f32 %v1271_v60, %v850_v58 }
  0xfe   : > { %1272 = vrsqrt.f32 %v854_v61  ;;  %vm857_vm13 = vcmp.eq.f32.partialorder %v854_v61, inf  ;;  %v860_v2 = vand.u32 2147483648, %v854_v61  ;;  %vm859_vm4 = vcmp.eq.f32.partialorder %v854_v61, 0.0 }
 0x108   : > { %v1273_v12 = vpop.eup %1272 }
 0x109   : > { %v856_v4 = vmul.f32 %v1273_v12, %v854_v61 }
 0x10b   : > { %v858_v10 = vsel %vm857_vm13, %v854_v61, %v856_v4 }
 0x10c   : > { %v861_v14 = vsel %vm859_vm4, %v860_v2, %v858_v10 }
 0x10d   : > { %v864_v9 = vsel %vm845_vm0, %v861_v14, -1.0 }
 0x10e   : > { %865 = vst [vmem:[%s380_s25] sm:$0xff] %v864_v9 }
 0x10f   : > { %1421 = shalt.err (!%p1418_p10)
}
 0x110   : > { %s1422_s4 = scalar_lea.hbm %s2617_s12, 128  ;;  %s1426_s6 = scalar_lea.hbm %s2704_s8, 256 }
 0x111   : > { %p1423_p9 = scmp.ne.s32.totalorder %s2617_s12, %s1422_s4  ;;  %p1427_p7 = scmp.lt.u32.totalorder %s2617_s12, %s2704_s8 }
 0x112   : > { %p1428_p5 = scmp.lt.u32.totalorder %s1426_s6, %s1422_s4  ;;  %p1430_p13 = scmp.lt.u32.totalorder %s1422_s4, %s2617_s12 }
 0x113   : > { %p1424_p2 = pnand %p1423_p9, %p2776_p4 }
 0x114   : > { %p1429_p11 = por %p1428_p5, %p1427_p7 }
 0x115   : > { %p1425_p12 = pneg %p1424_p2 }
 0x116   : > { %p1431_p0 = por %p1430_p13, %p1429_p11 }
 0x118   : > { %p1432_p1 = pnand %p1431_p0, %p1425_p12 }
 0x11a   : > { %1435 = shalt.err (!%p1432_p1)
}
 0x11b   : > { %1183 = dma.vmem_to_hbm [thread:$0]  (%p2776_p4), %s2609_s14, 128, %s2617_s12, %s2627_s3  }
 0x11c   : > { %s1436_s30 = scalar_lea.vmem %s2611_s10, 512  ;;  %s1537_s21 = smov [#allocation14]  }
 0x11d   : > { %p1437_p3 = scmp.ne.s32.totalorder %s2611_s10, %s1436_s30  ;;  %s1440_s25 = sshll.u32 %s1537_s21, 4  ;;  %s1441_s25 = int_to_ptr.vmem [resolvable:$false] %s1440_s25 }
 0x11e   : > { %s1442_s13 = scalar_lea.vmem %s1441_s25, 1024  ;;  %p1443_p10 = scmp.lt.s32.totalorder %s2611_s10, %s1441_s25 }
 0x11f   : > { %p1438_p6 = pnand %p1437_p3, %p2776_p4  ;;  %p1444_p9 = scmp.lt.s32.totalorder %s1442_s13, %s1436_s30 }
 0x121   : > { %p1439_p8 = pneg %p1438_p6  ;;  %p1445_p2 = por %p1444_p9, %p1443_p10 }
 0x123   : > { %p1446_p12 = pnand %p1445_p2, %p1439_p8 }
 0x125   : > { %1449 = shalt.err (!%p1446_p12)
}
 0x126   : > { %s1450_s14 = scalar_lea.hbm %s2623_s28, 512  ;;  %s1454_s12 = scalar_lea.hbm %s2705_s9, 1024 }
 0x127   : > { %p1451_p7 = scmp.ne.s32.totalorder %s2623_s28, %s1450_s14  ;;  %p1455_p13 = scmp.lt.u32.totalorder %s2623_s28, %s2705_s9 }
 0x128   : > { %p1456_p0 = scmp.lt.u32.totalorder %s1454_s12, %s1450_s14  ;;  %p1458_p3 = scmp.lt.u32.totalorder %s1450_s14, %s2623_s28 }
 0x129   : > { %p1452_p5 = pnand %p1451_p7, %p2776_p4 }
 0x12a   : > { %p1457_p1 = por %p1456_p0, %p1455_p13 }
 0x12b   : > { %p1453_p11 = pneg %p1452_p5 }
 0x12c   : > { %p1459_p6 = por %p1458_p3, %p1457_p1 }
 0x12e   : > { %p1460_p8 = pnand %p1459_p6, %p1453_p11 }
 0x130   : > { %1463 = shalt.err (!%p1460_p8)
}
 0x131   : > { %s1538_s29 = smov 128   ;;  %s1539_s2 = smov 8  }
 0x132   : > { %1184 = dma.vmem_to_hbm [thread:$0]  (%p2776_p4), %s2611_s10, 512, %s2623_s28, %s2627_s3, %s1538_s29, %s1538_s29, %s1539_s2  }
 0x133 PF: > { %s2777_s19 = sld [smem:[#allocation23_spill]]  ;;  %p1214_p10 = scmp.ge.s32.totalorder %s1528_s27, 2 }
 0x134   : > { %s948_s20 = sand.u32 1, %s1508_s0  }
 0x135   : > { %s949_s4 = scalar_lea.sflag [#allocation7], %s948_s20 }
 0x139   : > { %p2778_p9 = scmp.ne.s32.totalorder %s2777_s19, 0 }
 0x13b   : > { %p1199_p2 = pnand %p1214_p10, %p2778_p9 }
 0x13d   : > { %1499 = dma.done.wait (!%p1199_p2), %s949_s4, 128  }
 0x13e   : > { %1501 = vsyncadd (!%p1199_p2), %s949_s4, 4294967168  ;;  %s2779_s24 = sadd.s32 4294967294, %s1528_s27  }
 0x13f   : > { %s957_s18 = sand.u32 1, %s2779_s24  }
 0x140   : > { %s958_s6 = scalar_lea.sflag [#allocation13], %s957_s18 }
 0x141   : > { %1503 = dma.done.wait (!%p1199_p2), %s958_s6, 640  }
 0x142   : > { %1505 = vsyncadd (!%p1199_p2), %s958_s6, 4294966656  ;;  %s36_s27 = sadd.s32 1, %s1528_s27   ;;  %s2780_s11 = sld [smem:[#allocation20_spill]] }
 0x143   : > { %p33_p4 = scmp.ge.s32.totalorder %s36_s27, 4   ;;  %s2781_s24 = sld [smem:[#allocation24_spill]] }
 0x144   : > { %s2782_s25 = sld [smem:[#allocation21_spill]]  ;;  %s2783_s26 = sld [smem:[#allocation22_spill]] }
 0x145   : > { %s2784_s0 = smov %s1512_s1  ;;  %35 = sbr.rel (!%p33_p4) target bundleno = 31 (0x1f), region = 129 }
 0x148   : > { %s2785_s1 = smov %s2780_s11 }
 0x14c   :  { %972 = vsyncpa [#allocation6], 1 }
 0x14d   :  { %974 = vsyncpa [#allocation6 + $0x1], 1 }
 0x14e   :  { %975 = vsyncpa [#allocation9], 1 }
 0x14f   :  { %976 = vsyncpa [#allocation7], 1 }
 0x150   :  { %978 = vsyncpa [#allocation7 + $0x1], 1 }
 0x151   :  { %979 = vsyncpa [#allocation13], 1 }
 0x152   :  { %981 = vsyncpa [#allocation13 + $0x1], 1 }

</bundles_post_ra>
